<compile_context>
chip_gen: v7x
topology: tpu7x:2x2x1
jax: 0.10.0
libtpu: 0.0.40
codegen_flags: <defaults>
</compile_context>

<pallas_src>
import functools

import jax
import jax.numpy as jnp
from jax.experimental import pallas as pl
from jax.experimental.pallas import tpu as pltpu


def _self_attention_kernel(x_ref, wq_ref, wk_ref, wv_ref, wu_ref, bu_ref, o_ref,
                           *, heads, k):
    x = x_ref[...]                                   # (Bblk, T, K) f32
    bblk, t, _ = x.shape
    scale = 1.0 / (k ** 0.5)                         # fold both k**-0.25 factors into q

    wq = wq_ref[...]                                 # (K, H*K)
    wk = wk_ref[...]
    wv = wv_ref[...]
    wu = wu_ref[...]                                 # (H*K, K)

    # Fused full-width projections: one (Bblk*T, K) @ (K, H*K) matmul each.
    q_all = jnp.einsum('btk,kd->btd', x, wq,
                       preferred_element_type=jnp.float32) * scale   # (Bblk, T, HK)
    k_all = jnp.einsum('btk,kd->btd', x, wk,
                       preferred_element_type=jnp.float32)            # (Bblk, T, HK)
    v_all = jnp.einsum('btk,kd->btd', x, wv,
                       preferred_element_type=jnp.float32)            # (Bblk, T, HK)

    # Per-head attention with fused unify accumulation (no concat).
    # Static unrolled loop is fine at small T/heads.
    # TODO(synk): switch to lax.fori_loop over heads (flash-style) before
    # scaling T so live (T, T) score tiles stay bounded on v7x's 64 MiB VMEM.
    acc = jnp.zeros((bblk, t, k), jnp.float32)
    for h in range(heads):
        lo, hi = h * k, (h + 1) * k
        q_h = q_all[:, :, lo:hi]                     # (Bblk, T, K)
        k_h = k_all[:, :, lo:hi]
        v_h = v_all[:, :, lo:hi]

        # scores: contract the last dims -> transpose absorbed by the MXU feed.
        s = jnp.einsum('btk,bsk->bts', q_h, k_h,
                       preferred_element_type=jnp.float32)            # (Bblk, T, T)

        # numerically stable softmax over keys; reciprocal on the EUP slot.
        s = s - jnp.max(s, axis=-1, keepdims=True)
        e = jnp.exp(s)
        p = e * pl.reciprocal(jnp.sum(e, axis=-1, keepdims=True), approx=True)

        ctx = jnp.einsum('bts,bsk->btk', p, v_h,
                         preferred_element_type=jnp.float32)          # (Bblk, T, K)

        # Fold this head's unify contribution: (T,K) @ (K,K) accumulation.
        wu_h = wu[lo:hi, :]                                            # (K, K)
        acc = acc + jnp.einsum('btk,kd->btd', ctx, wu_h,
                               preferred_element_type=jnp.float32)     # (Bblk, T, K)

    o_ref[...] = acc + bu_ref[...]                   # bias (1, K) broadcasts


def self_attention(x, wq, wk, wv, wu, bu, *, heads, batch_block=None):
    """x: (B, T, K).  wq/wk/wv: (K, H*K).  wu: (H*K, K).  bu: (1, K)."""
    B, T, K = x.shape
    HK = heads * K

    if batch_block is None:
        batch_block = next(c for c in (8, 4, 2, 1) if B % c == 0)
    assert B % batch_block == 0

    kernel = functools.partial(_self_attention_kernel, heads=heads, k=K)

    return pl.pallas_call(
        kernel,
        out_shape=jax.ShapeDtypeStruct((B, T, K), jnp.float32),
        grid_spec=pltpu.PrefetchScalarGridSpec(
            num_scalar_prefetch=0,
            grid=(B // batch_block,),
            in_specs=[
                pl.BlockSpec((batch_block, T, K), lambda b: (b, 0, 0)),  # x
                pl.BlockSpec((K, HK), lambda b: (0, 0)),                 # wq
                pl.BlockSpec((K, HK), lambda b: (0, 0)),                 # wk
                pl.BlockSpec((K, HK), lambda b: (0, 0)),                 # wv
                pl.BlockSpec((HK, K), lambda b: (0, 0)),                 # wu
                pl.BlockSpec((1, K), lambda b: (0, 0)),                  # bu
            ],
            out_specs=pl.BlockSpec((batch_block, T, K), lambda b: (b, 0, 0)),
        ),
        compiler_params=pltpu.CompilerParams(
            dimension_semantics=("parallel",)),                          # megacore on v7x
    )(x, wq, wk, wv, wu, bu)


def self_attention_ref(x, wq, wk, wv, wu, bu, *, heads):
    """Pure-JAX mirror of the PyTorch forward, for validation."""
    b, t, k = x.shape
    h = heads
    q = (x @ wq).reshape(b, t, h, k)
    kk = (x @ wk).reshape(b, t, h, k)
    v = (x @ wv).reshape(b, t, h, k)
    q = jnp.transpose(q, (0, 2, 1, 3)).reshape(b * h, t, k) / (k ** 0.25)
    kk = jnp.transpose(kk, (0, 2, 1, 3)).reshape(b * h, t, k) / (k ** 0.25)
    v = jnp.transpose(v, (0, 2, 1, 3)).reshape(b * h, t, k)
    dot = jnp.einsum("btk,bsk->bts", q, kk)
    dot = jax.nn.softmax(dot, axis=2)
    out = jnp.einsum("bts,bsk->btk", dot, v).reshape(b, h, t, k)
    out = jnp.transpose(out, (0, 2, 1, 3)).reshape(b, t, h * k)
    return out @ wu + bu


if __name__ == "__main__":
    B, T, K, HEADS = 4, 8, 16, 8   # >= 2 grid steps with batch_block=2

    key = jax.random.PRNGKey(0)
    kx, kq, kk_, kv, ku, kb = jax.random.split(key, 6)

    x = jax.random.normal(kx, (B, T, K), dtype=jnp.float32)
    # nn.Linear(k, k*heads, bias=False) weight is (k*heads, k); store transposed.
    wq = jax.random.normal(kq, (K, K * HEADS), dtype=jnp.float32) * 0.05
    wk = jax.random.normal(kk_, (K, K * HEADS), dtype=jnp.float32) * 0.05
    wv = jax.random.normal(kv, (K, K * HEADS), dtype=jnp.float32) * 0.05
    # nn.Linear(heads*k, k) weight is (k, heads*k); store transposed, plus bias.
    wu = jax.random.normal(ku, (K * HEADS, K), dtype=jnp.float32) * 0.05
    bu = jax.random.normal(kb, (1, K), dtype=jnp.float32) * 0.05

    out = self_attention(x, wq, wk, wv, wu, bu, heads=HEADS, batch_block=2)
    out = jax.block_until_ready(out)

    ref = self_attention_ref(x, wq, wk, wv, wu, bu, heads=HEADS)
    assert out.shape == (B, T, K)
    # Tolerance leaves headroom for the EUP approximate-reciprocal softmax.
    assert jnp.allclose(out, ref, atol=5e-3, rtol=5e-3), "mismatch vs reference"

    print("KERNEL_OK")
</pallas_src>

<mosaic_0001>
module attributes {stable_mosaic.version = 11 : i64} {
  func.func @_self_attention_kernel(%arg0: i32, %arg1: memref<2x8x16xf32, #tpu.memory_space<vmem>>, %arg2: memref<16x128xf32, #tpu.memory_space<vmem>>, %arg3: memref<16x128xf32, #tpu.memory_space<vmem>>, %arg4: memref<16x128xf32, #tpu.memory_space<vmem>>, %arg5: memref<128x16xf32, #tpu.memory_space<vmem>>, %arg6: memref<1x16xf32, #tpu.memory_space<vmem>>, %arg7: memref<2x8x16xf32, #tpu.memory_space<vmem>>) attributes {dimension_semantics = [#tpu.dimension_semantics<parallel>], iteration_bounds = array<i64: 2>, scalar_prefetch = 0 : i64, scratch_operands = 0 : i64, tpu.core_type = #tpu.core_type<tc>, window_params = [{transform_indices = @transform_0, window_bounds = array<i64: 2, 8, 16>}, {pipeline_mode = #tpu.pipeline_mode<synchronous>, transform_indices = @transform_1, window_bounds = array<i64: 16, 128>}, {pipeline_mode = #tpu.pipeline_mode<synchronous>, transform_indices = @transform_2, window_bounds = array<i64: 16, 128>}, {pipeline_mode = #tpu.pipeline_mode<synchronous>, transform_indices = @transform_3, window_bounds = array<i64: 16, 128>}, {pipeline_mode = #tpu.pipeline_mode<synchronous>, transform_indices = @transform_4, window_bounds = array<i64: 128, 16>}, {pipeline_mode = #tpu.pipeline_mode<synchronous>, transform_indices = @transform_5, window_bounds = array<i64: 1, 16>}, {transform_indices = @transform_6, window_bounds = array<i64: 2, 8, 16>}]} {
    %c0 = arith.constant 0 : index
    %c0_0 = arith.constant 0 : index
    %c0_1 = arith.constant 0 : index
    %0 = vector.load %arg1[%c0, %c0_0, %c0_1] : memref<2x8x16xf32, #tpu.memory_space<vmem>>, vector<2x8x16xf32>
    %c0_2 = arith.constant 0 : index
    %c0_3 = arith.constant 0 : index
    %1 = vector.load %arg2[%c0_2, %c0_3] : memref<16x128xf32, #tpu.memory_space<vmem>>, vector<16x128xf32>
    %c0_4 = arith.constant 0 : index
    %c0_5 = arith.constant 0 : index
    %2 = vector.load %arg3[%c0_4, %c0_5] : memref<16x128xf32, #tpu.memory_space<vmem>>, vector<16x128xf32>
    %c0_6 = arith.constant 0 : index
    %c0_7 = arith.constant 0 : index
    %3 = vector.load %arg4[%c0_6, %c0_7] : memref<16x128xf32, #tpu.memory_space<vmem>>, vector<16x128xf32>
    %c0_8 = arith.constant 0 : index
    %c0_9 = arith.constant 0 : index
    %4 = vector.load %arg5[%c0_8, %c0_9] : memref<128x16xf32, #tpu.memory_space<vmem>>, vector<128x16xf32>
    "tpu.trace_start"() <{level = 10 : i32, message = "btk,kd->btd"}> : () -> ()
    %cst = arith.constant dense<0.000000e+00> : vector<2x8x128xf32>
    %5 = tpu.matmul %0, %1, %cst {dimension_numbers = #tpu.dot_dimension_numbers<[2], [0], [0, 1], [1], [0, 0, 0, 1, 1, 1], [], []>} : vector<2x8x16xf32>, vector<16x128xf32>, vector<2x8x128xf32> -> vector<2x8x128xf32>
    "tpu.trace_stop"() : () -> ()
    %cst_10 = arith.constant 2.500000e-01 : f32
    %6 = vector.broadcast %cst_10 : f32 to vector<2x8x128xf32>
    %7 = arith.mulf %5, %6 : vector<2x8x128xf32>
    "tpu.trace_start"() <{level = 10 : i32, message = "btk,kd->btd"}> : () -> ()
    %cst_11 = arith.constant dense<0.000000e+00> : vector<2x8x128xf32>
    %8 = tpu.matmul %0, %2, %cst_11 {dimension_numbers = #tpu.dot_dimension_numbers<[2], [0], [0, 1], [1], [0, 0, 0, 1, 1, 1], [], []>} : vector<2x8x16xf32>, vector<16x128xf32>, vector<2x8x128xf32> -> vector<2x8x128xf32>
    %cst_12 = arith.constant dense<0.000000e+00> : vector<2x8x128xf32>
    %9 = tpu.matmul %0, %3, %cst_12 {dimension_numbers = #tpu.dot_dimension_numbers<[2], [0], [0, 1], [1], [0, 0, 0, 1, 1, 1], [], []>} : vector<2x8x16xf32>, vector<16x128xf32>, vector<2x8x128xf32> -> vector<2x8x128xf32>
    %cst_13 = arith.constant 0.000000e+00 : f32
    "tpu.trace_stop"() : () -> ()
    %10 = vector.broadcast %cst_13 : f32 to vector<2x8x16xf32>
    %11 = vector.extract_strided_slice %7 {offsets = [0, 0, 0], sizes = [2, 8, 16], strides = [1, 1, 1]} : vector<2x8x128xf32> to vector<2x8x16xf32>
    %12 = vector.extract_strided_slice %8 {offsets = [0, 0, 0], sizes = [2, 8, 16], strides = [1, 1, 1]} : vector<2x8x128xf32> to vector<2x8x16xf32>
    %13 = vector.extract_strided_slice %9 {offsets = [0, 0, 0], sizes = [2, 8, 16], strides = [1, 1, 1]} : vector<2x8x128xf32> to vector<2x8x16xf32>
    "tpu.trace_start"() <{level = 10 : i32, message = "btk,bsk->bts"}> : () -> ()
    %cst_14 = arith.constant dense<0.000000e+00> : vector<2x8x8xf32>
    %14 = tpu.matmul %11, %12, %cst_14 {dimension_numbers = #tpu.dot_dimension_numbers<[2], [2], [1], [1], [0, 0, 0, 1, 1, 1], [0], [0]>} : vector<2x8x16xf32>, vector<2x8x16xf32>, vector<2x8x8xf32> -> vector<2x8x8xf32>
    "tpu.trace_stop"() : () -> ()
    %cst_15 = arith.constant dense<0xFF800000> : vector<2x8xf32>
    %15 = vector.multi_reduction <maximumf>, %14, %cst_15 [2] : vector<2x8x8xf32> to vector<2x8xf32>
    %16 = vector.shape_cast %15 : vector<2x8xf32> to vector<2x8x1xf32>
    %17 = vector.broadcast %16 : vector<2x8x1xf32> to vector<2x8x8xf32>
    %18 = arith.subf %14, %17 : vector<2x8x8xf32>
    %19 = math.exp %18 : vector<2x8x8xf32>
    %cst_16 = arith.constant dense<0.000000e+00> : vector<2x8xf32>
    %20 = vector.multi_reduction <add>, %19, %cst_16 [2] : vector<2x8x8xf32> to vector<2x8xf32>
    %21 = vector.shape_cast %20 : vector<2x8xf32> to vector<2x8x1xf32>
    %22 = tpu.reciprocal %21 {approx = true} : vector<2x8x1xf32> -> vector<2x8x1xf32>
    %23 = vector.broadcast %22 : vector<2x8x1xf32> to vector<2x8x8xf32>
    %24 = arith.mulf %19, %23 : vector<2x8x8xf32>
    "tpu.trace_start"() <{level = 10 : i32, message = "bts,bsk->btk"}> : () -> ()
    %cst_17 = arith.constant dense<0.000000e+00> : vector<2x8x16xf32>
    %25 = tpu.matmul %24, %13, %cst_17 {dimension_numbers = #tpu.dot_dimension_numbers<[2], [1], [1], [2], [0, 0, 0, 1, 1, 2], [0], [0]>} : vector<2x8x8xf32>, vector<2x8x16xf32>, vector<2x8x16xf32> -> vector<2x8x16xf32>
    "tpu.trace_stop"() : () -> ()
    %26 = vector.extract_strided_slice %4 {offsets = [0, 0], sizes = [16, 16], strides = [1, 1]} : vector<128x16xf32> to vector<16x16xf32>
    "tpu.trace_start"() <{level = 10 : i32, message = "btk,kd->btd"}> : () -> ()
    %cst_18 = arith.constant dense<0.000000e+00> : vector<2x8x16xf32>
    %27 = tpu.matmul %25, %26, %cst_18 {dimension_numbers = #tpu.dot_dimension_numbers<[2], [0], [0, 1], [1], [0, 0, 0, 1, 1, 1], [], []>} : vector<2x8x16xf32>, vector<16x16xf32>, vector<2x8x16xf32> -> vector<2x8x16xf32>
    "tpu.trace_stop"() : () -> ()
    %28 = arith.addf %10, %27 : vector<2x8x16xf32>
    %29 = vector.extract_strided_slice %7 {offsets = [0, 0, 16], sizes = [2, 8, 16], strides = [1, 1, 1]} : vector<2x8x128xf32> to vector<2x8x16xf32>
    %30 = vector.extract_strided_slice %8 {offsets = [0, 0, 16], sizes = [2, 8, 16], strides = [1, 1, 1]} : vector<2x8x128xf32> to vector<2x8x16xf32>
    %31 = vector.extract_strided_slice %9 {offsets = [0, 0, 16], sizes = [2, 8, 16], strides = [1, 1, 1]} : vector<2x8x128xf32> to vector<2x8x16xf32>
    "tpu.trace_start"() <{level = 10 : i32, message = "btk,bsk->bts"}> : () -> ()
    %cst_19 = arith.constant dense<0.000000e+00> : vector<2x8x8xf32>
    %32 = tpu.matmul %29, %30, %cst_19 {dimension_numbers = #tpu.dot_dimension_numbers<[2], [2], [1], [1], [0, 0, 0, 1, 1, 1], [0], [0]>} : vector<2x8x16xf32>, vector<2x8x16xf32>, vector<2x8x8xf32> -> vector<2x8x8xf32>
    "tpu.trace_stop"() : () -> ()
    %cst_20 = arith.constant dense<0xFF800000> : vector<2x8xf32>
    %33 = vector.multi_reduction <maximumf>, %32, %cst_20 [2] : vector<2x8x8xf32> to vector<2x8xf32>
    %34 = vector.shape_cast %33 : vector<2x8xf32> to vector<2x8x1xf32>
    %35 = vector.broadcast %34 : vector<2x8x1xf32> to vector<2x8x8xf32>
    %36 = arith.subf %32, %35 : vector<2x8x8xf32>
    %37 = math.exp %36 : vector<2x8x8xf32>
    %cst_21 = arith.constant dense<0.000000e+00> : vector<2x8xf32>
    %38 = vector.multi_reduction <add>, %37, %cst_21 [2] : vector<2x8x8xf32> to vector<2x8xf32>
    %39 = vector.shape_cast %38 : vector<2x8xf32> to vector<2x8x1xf32>
    %40 = tpu.reciprocal %39 {approx = true} : vector<2x8x1xf32> -> vector<2x8x1xf32>
    %41 = vector.broadcast %40 : vector<2x8x1xf32> to vector<2x8x8xf32>
    %42 = arith.mulf %37, %41 : vector<2x8x8xf32>
    "tpu.trace_start"() <{level = 10 : i32, message = "bts,bsk->btk"}> : () -> ()
    %cst_22 = arith.constant dense<0.000000e+00> : vector<2x8x16xf32>
    %43 = tpu.matmul %42, %31, %cst_22 {dimension_numbers = #tpu.dot_dimension_numbers<[2], [1], [1], [2], [0, 0, 0, 1, 1, 2], [0], [0]>} : vector<2x8x8xf32>, vector<2x8x16xf32>, vector<2x8x16xf32> -> vector<2x8x16xf32>
    "tpu.trace_stop"() : () -> ()
    %44 = vector.extract_strided_slice %4 {offsets = [16, 0], sizes = [16, 16], strides = [1, 1]} : vector<128x16xf32> to vector<16x16xf32>
    "tpu.trace_start"() <{level = 10 : i32, message = "btk,kd->btd"}> : () -> ()
    %cst_23 = arith.constant dense<0.000000e+00> : vector<2x8x16xf32>
    %45 = tpu.matmul %43, %44, %cst_23 {dimension_numbers = #tpu.dot_dimension_numbers<[2], [0], [0, 1], [1], [0, 0, 0, 1, 1, 1], [], []>} : vector<2x8x16xf32>, vector<16x16xf32>, vector<2x8x16xf32> -> vector<2x8x16xf32>
    "tpu.trace_stop"() : () -> ()
    %46 = arith.addf %28, %45 : vector<2x8x16xf32>
    %47 = vector.extract_strided_slice %7 {offsets = [0, 0, 32], sizes = [2, 8, 16], strides = [1, 1, 1]} : vector<2x8x128xf32> to vector<2x8x16xf32>
    %48 = vector.extract_strided_slice %8 {offsets = [0, 0, 32], sizes = [2, 8, 16], strides = [1, 1, 1]} : vector<2x8x128xf32> to vector<2x8x16xf32>
    %49 = vector.extract_strided_slice %9 {offsets = [0, 0, 32], sizes = [2, 8, 16], strides = [1, 1, 1]} : vector<2x8x128xf32> to vector<2x8x16xf32>
    "tpu.trace_start"() <{level = 10 : i32, message = "btk,bsk->bts"}> : () -> ()
    %cst_24 = arith.constant dense<0.000000e+00> : vector<2x8x8xf32>
    %50 = tpu.matmul %47, %48, %cst_24 {dimension_numbers = #tpu.dot_dimension_numbers<[2], [2], [1], [1], [0, 0, 0, 1, 1, 1], [0], [0]>} : vector<2x8x16xf32>, vector<2x8x16xf32>, vector<2x8x8xf32> -> vector<2x8x8xf32>
    "tpu.trace_stop"() : () -> ()
    %cst_25 = arith.constant dense<0xFF800000> : vector<2x8xf32>
    %51 = vector.multi_reduction <maximumf>, %50, %cst_25 [2] : vector<2x8x8xf32> to vector<2x8xf32>
    %52 = vector.shape_cast %51 : vector<2x8xf32> to vector<2x8x1xf32>
    %53 = vector.broadcast %52 : vector<2x8x1xf32> to vector<2x8x8xf32>
    %54 = arith.subf %50, %53 : vector<2x8x8xf32>
    %55 = math.exp %54 : vector<2x8x8xf32>
    %cst_26 = arith.constant dense<0.000000e+00> : vector<2x8xf32>
    %56 = vector.multi_reduction <add>, %55, %cst_26 [2] : vector<2x8x8xf32> to vector<2x8xf32>
    %57 = vector.shape_cast %56 : vector<2x8xf32> to vector<2x8x1xf32>
    %58 = tpu.reciprocal %57 {approx = true} : vector<2x8x1xf32> -> vector<2x8x1xf32>
    %59 = vector.broadcast %58 : vector<2x8x1xf32> to vector<2x8x8xf32>
    %60 = arith.mulf %55, %59 : vector<2x8x8xf32>
    "tpu.trace_start"() <{level = 10 : i32, message = "bts,bsk->btk"}> : () -> ()
    %cst_27 = arith.constant dense<0.000000e+00> : vector<2x8x16xf32>
    %61 = tpu.matmul %60, %49, %cst_27 {dimension_numbers = #tpu.dot_dimension_numbers<[2], [1], [1], [2], [0, 0, 0, 1, 1, 2], [0], [0]>} : vector<2x8x8xf32>, vector<2x8x16xf32>, vector<2x8x16xf32> -> vector<2x8x16xf32>
    "tpu.trace_stop"() : () -> ()
    %62 = vector.extract_strided_slice %4 {offsets = [32, 0], sizes = [16, 16], strides = [1, 1]} : vector<128x16xf32> to vector<16x16xf32>
    "tpu.trace_start"() <{level = 10 : i32, message = "btk,kd->btd"}> : () -> ()
    %cst_28 = arith.constant dense<0.000000e+00> : vector<2x8x16xf32>
    %63 = tpu.matmul %61, %62, %cst_28 {dimension_numbers = #tpu.dot_dimension_numbers<[2], [0], [0, 1], [1], [0, 0, 0, 1, 1, 1], [], []>} : vector<2x8x16xf32>, vector<16x16xf32>, vector<2x8x16xf32> -> vector<2x8x16xf32>
    "tpu.trace_stop"() : () -> ()
    %64 = arith.addf %46, %63 : vector<2x8x16xf32>
    %65 = vector.extract_strided_slice %7 {offsets = [0, 0, 48], sizes = [2, 8, 16], strides = [1, 1, 1]} : vector<2x8x128xf32> to vector<2x8x16xf32>
    %66 = vector.extract_strided_slice %8 {offsets = [0, 0, 48], sizes = [2, 8, 16], strides = [1, 1, 1]} : vector<2x8x128xf32> to vector<2x8x16xf32>
    %67 = vector.extract_strided_slice %9 {offsets = [0, 0, 48], sizes = [2, 8, 16], strides = [1, 1, 1]} : vector<2x8x128xf32> to vector<2x8x16xf32>
    "tpu.trace_start"() <{level = 10 : i32, message = "btk,bsk->bts"}> : () -> ()
    %cst_29 = arith.constant dense<0.000000e+00> : vector<2x8x8xf32>
    %68 = tpu.matmul %65, %66, %cst_29 {dimension_numbers = #tpu.dot_dimension_numbers<[2], [2], [1], [1], [0, 0, 0, 1, 1, 1], [0], [0]>} : vector<2x8x16xf32>, vector<2x8x16xf32>, vector<2x8x8xf32> -> vector<2x8x8xf32>
    "tpu.trace_stop"() : () -> ()
    %cst_30 = arith.constant dense<0xFF800000> : vector<2x8xf32>
    %69 = vector.multi_reduction <maximumf>, %68, %cst_30 [2] : vector<2x8x8xf32> to vector<2x8xf32>
    %70 = vector.shape_cast %69 : vector<2x8xf32> to vector<2x8x1xf32>
    %71 = vector.broadcast %70 : vector<2x8x1xf32> to vector<2x8x8xf32>
    %72 = arith.subf %68, %71 : vector<2x8x8xf32>
    %73 = math.exp %72 : vector<2x8x8xf32>
    %cst_31 = arith.constant dense<0.000000e+00> : vector<2x8xf32>
    %74 = vector.multi_reduction <add>, %73, %cst_31 [2] : vector<2x8x8xf32> to vector<2x8xf32>
    %75 = vector.shape_cast %74 : vector<2x8xf32> to vector<2x8x1xf32>
    %76 = tpu.reciprocal %75 {approx = true} : vector<2x8x1xf32> -> vector<2x8x1xf32>
    %77 = vector.broadcast %76 : vector<2x8x1xf32> to vector<2x8x8xf32>
    %78 = arith.mulf %73, %77 : vector<2x8x8xf32>
    "tpu.trace_start"() <{level = 10 : i32, message = "bts,bsk->btk"}> : () -> ()
    %cst_32 = arith.constant dense<0.000000e+00> : vector<2x8x16xf32>
    %79 = tpu.matmul %78, %67, %cst_32 {dimension_numbers = #tpu.dot_dimension_numbers<[2], [1], [1], [2], [0, 0, 0, 1, 1, 2], [0], [0]>} : vector<2x8x8xf32>, vector<2x8x16xf32>, vector<2x8x16xf32> -> vector<2x8x16xf32>
    "tpu.trace_stop"() : () -> ()
    %80 = vector.extract_strided_slice %4 {offsets = [48, 0], sizes = [16, 16], strides = [1, 1]} : vector<128x16xf32> to vector<16x16xf32>
    "tpu.trace_start"() <{level = 10 : i32, message = "btk,kd->btd"}> : () -> ()
    %cst_33 = arith.constant dense<0.000000e+00> : vector<2x8x16xf32>
    %81 = tpu.matmul %79, %80, %cst_33 {dimension_numbers = #tpu.dot_dimension_numbers<[2], [0], [0, 1], [1], [0, 0, 0, 1, 1, 1], [], []>} : vector<2x8x16xf32>, vector<16x16xf32>, vector<2x8x16xf32> -> vector<2x8x16xf32>
    "tpu.trace_stop"() : () -> ()
    %82 = arith.addf %64, %81 : vector<2x8x16xf32>
    %83 = vector.extract_strided_slice %7 {offsets = [0, 0, 64], sizes = [2, 8, 16], strides = [1, 1, 1]} : vector<2x8x128xf32> to vector<2x8x16xf32>
    %84 = vector.extract_strided_slice %8 {offsets = [0, 0, 64], sizes = [2, 8, 16], strides = [1, 1, 1]} : vector<2x8x128xf32> to vector<2x8x16xf32>
    %85 = vector.extract_strided_slice %9 {offsets = [0, 0, 64], sizes = [2, 8, 16], strides = [1, 1, 1]} : vector<2x8x128xf32> to vector<2x8x16xf32>
    "tpu.trace_start"() <{level = 10 : i32, message = "btk,bsk->bts"}> : () -> ()
    %cst_34 = arith.constant dense<0.000000e+00> : vector<2x8x8xf32>
    %86 = tpu.matmul %83, %84, %cst_34 {dimension_numbers = #tpu.dot_dimension_numbers<[2], [2], [1], [1], [0, 0, 0, 1, 1, 1], [0], [0]>} : vector<2x8x16xf32>, vector<2x8x16xf32>, vector<2x8x8xf32> -> vector<2x8x8xf32>
    "tpu.trace_stop"() : () -> ()
    %cst_35 = arith.constant dense<0xFF800000> : vector<2x8xf32>
    %87 = vector.multi_reduction <maximumf>, %86, %cst_35 [2] : vector<2x8x8xf32> to vector<2x8xf32>
    %88 = vector.shape_cast %87 : vector<2x8xf32> to vector<2x8x1xf32>
    %89 = vector.broadcast %88 : vector<2x8x1xf32> to vector<2x8x8xf32>
    %90 = arith.subf %86, %89 : vector<2x8x8xf32>
    %91 = math.exp %90 : vector<2x8x8xf32>
    %cst_36 = arith.constant dense<0.000000e+00> : vector<2x8xf32>
    %92 = vector.multi_reduction <add>, %91, %cst_36 [2] : vector<2x8x8xf32> to vector<2x8xf32>
    %93 = vector.shape_cast %92 : vector<2x8xf32> to vector<2x8x1xf32>
    %94 = tpu.reciprocal %93 {approx = true} : vector<2x8x1xf32> -> vector<2x8x1xf32>
    %95 = vector.broadcast %94 : vector<2x8x1xf32> to vector<2x8x8xf32>
    %96 = arith.mulf %91, %95 : vector<2x8x8xf32>
    "tpu.trace_start"() <{level = 10 : i32, message = "bts,bsk->btk"}> : () -> ()
    %cst_37 = arith.constant dense<0.000000e+00> : vector<2x8x16xf32>
    %97 = tpu.matmul %96, %85, %cst_37 {dimension_numbers = #tpu.dot_dimension_numbers<[2], [1], [1], [2], [0, 0, 0, 1, 1, 2], [0], [0]>} : vector<2x8x8xf32>, vector<2x8x16xf32>, vector<2x8x16xf32> -> vector<2x8x16xf32>
    "tpu.trace_stop"() : () -> ()
    %98 = vector.extract_strided_slice %4 {offsets = [64, 0], sizes = [16, 16], strides = [1, 1]} : vector<128x16xf32> to vector<16x16xf32>
    "tpu.trace_start"() <{level = 10 : i32, message = "btk,kd->btd"}> : () -> ()
    %cst_38 = arith.constant dense<0.000000e+00> : vector<2x8x16xf32>
    %99 = tpu.matmul %97, %98, %cst_38 {dimension_numbers = #tpu.dot_dimension_numbers<[2], [0], [0, 1], [1], [0, 0, 0, 1, 1, 1], [], []>} : vector<2x8x16xf32>, vector<16x16xf32>, vector<2x8x16xf32> -> vector<2x8x16xf32>
    "tpu.trace_stop"() : () -> ()
    %100 = arith.addf %82, %99 : vector<2x8x16xf32>
    %101 = vector.extract_strided_slice %7 {offsets = [0, 0, 80], sizes = [2, 8, 16], strides = [1, 1, 1]} : vector<2x8x128xf32> to vector<2x8x16xf32>
    %102 = vector.extract_strided_slice %8 {offsets = [0, 0, 80], sizes = [2, 8, 16], strides = [1, 1, 1]} : vector<2x8x128xf32> to vector<2x8x16xf32>
    %103 = vector.extract_strided_slice %9 {offsets = [0, 0, 80], sizes = [2, 8, 16], strides = [1, 1, 1]} : vector<2x8x128xf32> to vector<2x8x16xf32>
    "tpu.trace_start"() <{level = 10 : i32, message = "btk,bsk->bts"}> : () -> ()
    %cst_39 = arith.constant dense<0.000000e+00> : vector<2x8x8xf32>
    %104 = tpu.matmul %101, %102, %cst_39 {dimension_numbers = #tpu.dot_dimension_numbers<[2], [2], [1], [1], [0, 0, 0, 1, 1, 1], [0], [0]>} : vector<2x8x16xf32>, vector<2x8x16xf32>, vector<2x8x8xf32> -> vector<2x8x8xf32>
    "tpu.trace_stop"() : () -> ()
    %cst_40 = arith.constant dense<0xFF800000> : vector<2x8xf32>
    %105 = vector.multi_reduction <maximumf>, %104, %cst_40 [2] : vector<2x8x8xf32> to vector<2x8xf32>
    %106 = vector.shape_cast %105 : vector<2x8xf32> to vector<2x8x1xf32>
    %107 = vector.broadcast %106 : vector<2x8x1xf32> to vector<2x8x8xf32>
    %108 = arith.subf %104, %107 : vector<2x8x8xf32>
    %109 = math.exp %108 : vector<2x8x8xf32>
    %cst_41 = arith.constant dense<0.000000e+00> : vector<2x8xf32>
    %110 = vector.multi_reduction <add>, %109, %cst_41 [2] : vector<2x8x8xf32> to vector<2x8xf32>
    %111 = vector.shape_cast %110 : vector<2x8xf32> to vector<2x8x1xf32>
    %112 = tpu.reciprocal %111 {approx = true} : vector<2x8x1xf32> -> vector<2x8x1xf32>
    %113 = vector.broadcast %112 : vector<2x8x1xf32> to vector<2x8x8xf32>
    %114 = arith.mulf %109, %113 : vector<2x8x8xf32>
    "tpu.trace_start"() <{level = 10 : i32, message = "bts,bsk->btk"}> : () -> ()
    %cst_42 = arith.constant dense<0.000000e+00> : vector<2x8x16xf32>
    %115 = tpu.matmul %114, %103, %cst_42 {dimension_numbers = #tpu.dot_dimension_numbers<[2], [1], [1], [2], [0, 0, 0, 1, 1, 2], [0], [0]>} : vector<2x8x8xf32>, vector<2x8x16xf32>, vector<2x8x16xf32> -> vector<2x8x16xf32>
    "tpu.trace_stop"() : () -> ()
    %116 = vector.extract_strided_slice %4 {offsets = [80, 0], sizes = [16, 16], strides = [1, 1]} : vector<128x16xf32> to vector<16x16xf32>
    "tpu.trace_start"() <{level = 10 : i32, message = "btk,kd->btd"}> : () -> ()
    %cst_43 = arith.constant dense<0.000000e+00> : vector<2x8x16xf32>
    %117 = tpu.matmul %115, %116, %cst_43 {dimension_numbers = #tpu.dot_dimension_numbers<[2], [0], [0, 1], [1], [0, 0, 0, 1, 1, 1], [], []>} : vector<2x8x16xf32>, vector<16x16xf32>, vector<2x8x16xf32> -> vector<2x8x16xf32>
    "tpu.trace_stop"() : () -> ()
    %118 = arith.addf %100, %117 : vector<2x8x16xf32>
    %119 = vector.extract_strided_slice %7 {offsets = [0, 0, 96], sizes = [2, 8, 16], strides = [1, 1, 1]} : vector<2x8x128xf32> to vector<2x8x16xf32>
    %120 = vector.extract_strided_slice %8 {offsets = [0, 0, 96], sizes = [2, 8, 16], strides = [1, 1, 1]} : vector<2x8x128xf32> to vector<2x8x16xf32>
    %121 = vector.extract_strided_slice %9 {offsets = [0, 0, 96], sizes = [2, 8, 16], strides = [1, 1, 1]} : vector<2x8x128xf32> to vector<2x8x16xf32>
    "tpu.trace_start"() <{level = 10 : i32, message = "btk,bsk->bts"}> : () -> ()
    %cst_44 = arith.constant dense<0.000000e+00> : vector<2x8x8xf32>
    %122 = tpu.matmul %119, %120, %cst_44 {dimension_numbers = #tpu.dot_dimension_numbers<[2], [2], [1], [1], [0, 0, 0, 1, 1, 1], [0], [0]>} : vector<2x8x16xf32>, vector<2x8x16xf32>, vector<2x8x8xf32> -> vector<2x8x8xf32>
    "tpu.trace_stop"() : () -> ()
    %cst_45 = arith.constant dense<0xFF800000> : vector<2x8xf32>
    %123 = vector.multi_reduction <maximumf>, %122, %cst_45 [2] : vector<2x8x8xf32> to vector<2x8xf32>
    %124 = vector.shape_cast %123 : vector<2x8xf32> to vector<2x8x1xf32>
    %125 = vector.broadcast %124 : vector<2x8x1xf32> to vector<2x8x8xf32>
    %126 = arith.subf %122, %125 : vector<2x8x8xf32>
    %127 = math.exp %126 : vector<2x8x8xf32>
    %cst_46 = arith.constant dense<0.000000e+00> : vector<2x8xf32>
    %128 = vector.multi_reduction <add>, %127, %cst_46 [2] : vector<2x8x8xf32> to vector<2x8xf32>
    %129 = vector.shape_cast %128 : vector<2x8xf32> to vector<2x8x1xf32>
    %130 = tpu.reciprocal %129 {approx = true} : vector<2x8x1xf32> -> vector<2x8x1xf32>
    %131 = vector.broadcast %130 : vector<2x8x1xf32> to vector<2x8x8xf32>
    %132 = arith.mulf %127, %131 : vector<2x8x8xf32>
    "tpu.trace_start"() <{level = 10 : i32, message = "bts,bsk->btk"}> : () -> ()
    %cst_47 = arith.constant dense<0.000000e+00> : vector<2x8x16xf32>
    %133 = tpu.matmul %132, %121, %cst_47 {dimension_numbers = #tpu.dot_dimension_numbers<[2], [1], [1], [2], [0, 0, 0, 1, 1, 2], [0], [0]>} : vector<2x8x8xf32>, vector<2x8x16xf32>, vector<2x8x16xf32> -> vector<2x8x16xf32>
    "tpu.trace_stop"() : () -> ()
    %134 = vector.extract_strided_slice %4 {offsets = [96, 0], sizes = [16, 16], strides = [1, 1]} : vector<128x16xf32> to vector<16x16xf32>
    "tpu.trace_start"() <{level = 10 : i32, message = "btk,kd->btd"}> : () -> ()
    %cst_48 = arith.constant dense<0.000000e+00> : vector<2x8x16xf32>
    %135 = tpu.matmul %133, %134, %cst_48 {dimension_numbers = #tpu.dot_dimension_numbers<[2], [0], [0, 1], [1], [0, 0, 0, 1, 1, 1], [], []>} : vector<2x8x16xf32>, vector<16x16xf32>, vector<2x8x16xf32> -> vector<2x8x16xf32>
    "tpu.trace_stop"() : () -> ()
    %136 = arith.addf %118, %135 : vector<2x8x16xf32>
    %137 = vector.extract_strided_slice %7 {offsets = [0, 0, 112], sizes = [2, 8, 16], strides = [1, 1, 1]} : vector<2x8x128xf32> to vector<2x8x16xf32>
    %138 = vector.extract_strided_slice %8 {offsets = [0, 0, 112], sizes = [2, 8, 16], strides = [1, 1, 1]} : vector<2x8x128xf32> to vector<2x8x16xf32>
    %139 = vector.extract_strided_slice %9 {offsets = [0, 0, 112], sizes = [2, 8, 16], strides = [1, 1, 1]} : vector<2x8x128xf32> to vector<2x8x16xf32>
    "tpu.trace_start"() <{level = 10 : i32, message = "btk,bsk->bts"}> : () -> ()
    %cst_49 = arith.constant dense<0.000000e+00> : vector<2x8x8xf32>
    %140 = tpu.matmul %137, %138, %cst_49 {dimension_numbers = #tpu.dot_dimension_numbers<[2], [2], [1], [1], [0, 0, 0, 1, 1, 1], [0], [0]>} : vector<2x8x16xf32>, vector<2x8x16xf32>, vector<2x8x8xf32> -> vector<2x8x8xf32>
    "tpu.trace_stop"() : () -> ()
    %cst_50 = arith.constant dense<0xFF800000> : vector<2x8xf32>
    %141 = vector.multi_reduction <maximumf>, %140, %cst_50 [2] : vector<2x8x8xf32> to vector<2x8xf32>
    %142 = vector.shape_cast %141 : vector<2x8xf32> to vector<2x8x1xf32>
    %143 = vector.broadcast %142 : vector<2x8x1xf32> to vector<2x8x8xf32>
    %144 = arith.subf %140, %143 : vector<2x8x8xf32>
    %145 = math.exp %144 : vector<2x8x8xf32>
    %cst_51 = arith.constant dense<0.000000e+00> : vector<2x8xf32>
    %146 = vector.multi_reduction <add>, %145, %cst_51 [2] : vector<2x8x8xf32> to vector<2x8xf32>
    %147 = vector.shape_cast %146 : vector<2x8xf32> to vector<2x8x1xf32>
    %148 = tpu.reciprocal %147 {approx = true} : vector<2x8x1xf32> -> vector<2x8x1xf32>
    %149 = vector.broadcast %148 : vector<2x8x1xf32> to vector<2x8x8xf32>
    %150 = arith.mulf %145, %149 : vector<2x8x8xf32>
    "tpu.trace_start"() <{level = 10 : i32, message = "bts,bsk->btk"}> : () -> ()
    %cst_52 = arith.constant dense<0.000000e+00> : vector<2x8x16xf32>
    %151 = tpu.matmul %150, %139, %cst_52 {dimension_numbers = #tpu.dot_dimension_numbers<[2], [1], [1], [2], [0, 0, 0, 1, 1, 2], [0], [0]>} : vector<2x8x8xf32>, vector<2x8x16xf32>, vector<2x8x16xf32> -> vector<2x8x16xf32>
    "tpu.trace_stop"() : () -> ()
    %152 = vector.extract_strided_slice %4 {offsets = [112, 0], sizes = [16, 16], strides = [1, 1]} : vector<128x16xf32> to vector<16x16xf32>
    "tpu.trace_start"() <{level = 10 : i32, message = "btk,kd->btd"}> : () -> ()
    %cst_53 = arith.constant dense<0.000000e+00> : vector<2x8x16xf32>
    %153 = tpu.matmul %151, %152, %cst_53 {dimension_numbers = #tpu.dot_dimension_numbers<[2], [0], [0, 1], [1], [0, 0, 0, 1, 1, 1], [], []>} : vector<2x8x16xf32>, vector<16x16xf32>, vector<2x8x16xf32> -> vector<2x8x16xf32>
    "tpu.trace_stop"() : () -> ()
    %154 = arith.addf %136, %153 : vector<2x8x16xf32>
    %c0_54 = arith.constant 0 : index
    %c0_55 = arith.constant 0 : index
    %155 = vector.load %arg6[%c0_54, %c0_55] : memref<1x16xf32, #tpu.memory_space<vmem>>, vector<1x16xf32>
    %156 = vector.shape_cast %155 : vector<1x16xf32> to vector<1x1x16xf32>
    %157 = vector.broadcast %156 : vector<1x1x16xf32> to vector<2x8x16xf32>
    %158 = arith.addf %154, %157 : vector<2x8x16xf32>
    %c0_56 = arith.constant 0 : index
    %c0_57 = arith.constant 0 : index
    %c0_58 = arith.constant 0 : index
    %159 = vector.load %arg7[%c0_56, %c0_57, %c0_58] : memref<2x8x16xf32, #tpu.memory_space<vmem>>, vector<2x8x16xf32>
    tpu.vector_store %arg7[%c0_56, %c0_57, %c0_58], %158 {strides = array<i32>} : memref<2x8x16xf32, #tpu.memory_space<vmem>>, vector<2x8x16xf32>,
    return
  }
  func.func @transform_0(%arg0: i32) -> (i32, i32, i32) {
    %c0_i32 = arith.constant 0 : i32
    %c0_i32_0 = arith.constant 0 : i32
    %c0_i32_1 = arith.constant 0 : i32
    return %arg0, %c0_i32, %c0_i32_0 : i32, i32, i32
  }
  func.func @transform_1(%arg0: i32) -> (i32, i32) {
    %c0_i32 = arith.constant 0 : i32
    %c0_i32_0 = arith.constant 0 : i32
    %c0_i32_1 = arith.constant 0 : i32
    return %c0_i32, %c0_i32_0 : i32, i32
  }
  func.func @transform_2(%arg0: i32) -> (i32, i32) {
    %c0_i32 = arith.constant 0 : i32
    %c0_i32_0 = arith.constant 0 : i32
    %c0_i32_1 = arith.constant 0 : i32
    return %c0_i32, %c0_i32_0 : i32, i32
  }
  func.func @transform_3(%arg0: i32) -> (i32, i32) {
    %c0_i32 = arith.constant 0 : i32
    %c0_i32_0 = arith.constant 0 : i32
    %c0_i32_1 = arith.constant 0 : i32
    return %c0_i32, %c0_i32_0 : i32, i32
  }
  func.func @transform_4(%arg0: i32) -> (i32, i32) {
    %c0_i32 = arith.constant 0 : i32
    %c0_i32_0 = arith.constant 0 : i32
    %c0_i32_1 = arith.constant 0 : i32
    return %c0_i32, %c0_i32_0 : i32, i32
  }
  func.func @transform_5(%arg0: i32) -> (i32, i32) {
    %c0_i32 = arith.constant 0 : i32
    %c0_i32_0 = arith.constant 0 : i32
    %c0_i32_1 = arith.constant 0 : i32
    return %c0_i32, %c0_i32_0 : i32, i32
  }
  func.func @transform_6(%arg0: i32) -> (i32, i32, i32) {
    %c0_i32 = arith.constant 0 : i32
    %c0_i32_0 = arith.constant 0 : i32
    %c0_i32_1 = arith.constant 0 : i32
    return %arg0, %c0_i32, %c0_i32_0 : i32, i32, i32
  }
}

</mosaic_0001>

<bundles_post_ra>
// kernel: tpu_custom_call.1
= control target key start
LH: loop header
LB: loop body
LE: loop exit
PB: predicated region body
PF: predicated region fallthrough
CT: control target
= control target key end

     0   :  { %11 = vsyncpa [#allocation3], 0  ;;  %s5082_s0 = inlined_call_operand.vmem [shape: f32[4,8,16], index: 0, kind: input, shape index: {}]   ;;  %s5083_s1 = inlined_call_operand.vmem [shape: f32[16,128], index: 1, kind: input, shape index: {}]   ;;  %s5084_s2 = inlined_call_operand.vmem [shape: f32[16,128], index: 2, kind: input, shape index: {}]   ;;  %s5085_s3 = inlined_call_operand.vmem [shape: f32[16,128], index: 3, kind: input, shape index: {}]   ;;  %s5086_s4 = inlined_call_operand.vmem [shape: f32[128,16], index: 4, kind: input, shape index: {}]   ;;  %s5087_s5 = inlined_call_operand.vmem [shape: f32[1,16], index: 5, kind: input, shape index: {}]   ;;  %s5088_s6 = inlined_call_operand.hbm [shape: f32[4,8,16], index: 6, kind: output, shape index: {}]  }
   0x1   :  { %13 = vsyncpa [#allocation3 + $0x1], 0  ;;  %s4603_s21 = smov 0   ;;  %s4605_s22 = smov 0  }
   0x2   :  { %s4607_s23 = smov 0   ;;  %s4609_s24 = smov 0  }
   0x3 LB: > { %s4624_s25 = sadd.s32 4294967295, %s4554_s24   ;;  %s3891_s26 = sadd.s32 4294967294, %s4554_s24   ;;  %s4554_s24 = sphi %s4609_s24, %s5094_s24   ;;  %s4550_s23 = sphi %s4607_s23, %s5093_s23   ;;  %s4546_s22 = sphi %s4605_s22, %s5092_s22   ;;  %s4542_s21 = sphi %s4603_s21, %s5091_s21  }
   0x4   : > { %s4628_s27 = sadd.s32 1, %s4554_s24   ;;  %s157_s28 = sadd.s32 1, %s4550_s23 }
   0x5   : > { %s154_s29 = ssub.s32 %s4554_s24, %s4628_s27  ;;  %p167_p0 = scmp.ne.s32.totalorder %s4550_s23, %s4546_s22 }
   0x6   : > { %p155_p1 = scmp.eq.s32.totalorder %s154_s29, 0  ;;  %p168_p2 = scmp.eq.s32.totalorder %s4624_s25, 1 }
   0x7   : > { %p173_p3 = scmp.ne.s32.totalorder %s4546_s22, %s4542_s21  ;;  %p174_p4 = scmp.eq.s32.totalorder %s3891_s26, 1 }
   0x8   : > { %s4639_s30 = scalar_select %p155_p1, %s4550_s23, %s157_s28  }
   0x9   : > { %p4641_p5 = por %p168_p2, %p167_p0  ;;  %p4645_p6 = por %p174_p4, %p173_p3 }
   0xa   : > { %p3894_p7 = scmp.ge.s32.totalorder %s4554_s24, 1  ;;  %p216_p8 = scmp.lt.s32.totalorder %s4554_s24, 3 }
   0xc   : > { %p217_p9 = pnand %p3894_p7, %p216_p8 }
   0xd   : > { %v257_v0 = vld [vmem:[%s5084_s2] sm:$0xff] (!%p217_p9)  ;;  %v258_v1 = vld [vmem:[%s5084_s2 + $0x8] sm:$0xff] (!%p217_p9)  ;;  %s3896_s15 = sshll.u32 (!%p217_p9), %s4624_s25, 1  ;;  %vm277_vm0 = vcmask (!%p217_p9), 130048   ;;  %v4556_v11 = vmov (!%p217_p9), 0.0   ;;  %vm4557_vm1 = vmmov (!%p217_p9), 0  }
   0xe   : > { %220 = sbr.rel (%p217_p9) target bundleno = 5143 (0x1417), region = 44  ;;  %v255_v2 = vld [vmem:[%s5083_s1] sm:$0xff] (!%p217_p9)  ;;  %v4324_v3 = vpack.c.bf16 (!%p217_p9), %v258_v1, %v257_v0  ;;  %v256_v4 = vld [vmem:[%s5083_s1 + $0x8] sm:$0xff] (!%p217_p9)  ;;  %p247_p10 = scmp.lt.s32.totalorder (!%p217_p9), %s3896_s15, 3  ;;  %vm663_vm2 = vcmask (!%p217_p9), 64512  }
   0xf   : > { %v259_v5 = vld [vmem:[%s5085_s3] sm:$0xff] (!%p217_p9)  ;;  %v260_v6 = vld [vmem:[%s5085_s3 + $0x8] sm:$0xff] (!%p217_p9)  ;;  %v4320_v7 = vpack.c.bf16 (!%p217_p9), %v256_v4, %v255_v2  ;;  %s4558_s11 = smov (!%p217_p9), 112   ;;  %s4559_s12 = smov (!%p217_p9), 96  }
  0x10   : > { %v4328_v8 = vpack.c.bf16 (!%p217_p9), %v260_v6, %v259_v5  ;;  %4325 = vmatprep.subr.bf16.mxu1 (!%p217_p9), %v4324_v3  ;;  %s4560_s26 = smov (!%p217_p9), 80   ;;  %s4563_s17 = smov (!%p217_p9), 32  }
  0x11   : > { %4321 = vmatprep.subr.bf16.mxu0 (!%p217_p9), %v4320_v7  ;;  %4327 = vmatpush3.bf16.msra.mxu1 (!%p217_p9), %v4324_v3  ;;  %s243_s20 = sand.u32 (!%p217_p9), 1, %s4546_s22   ;;  %s4565_s16 = smov (!%p217_p9), [#allocation2]  }
  0x12   : > { %4323 = vmatpush3.bf16.msra.mxu0 (!%p217_p9), %v4320_v7  ;;  %4104 = vmatprep.subr.mxu1 (!%p217_p9), %v4556_v11 }
  0x13   : > { %4329 = vmatprep.subr.bf16.mxu0 (!%p217_p9), %v4328_v8 }
  0x15   : > { %s5096_s15 = smov (!%p247_p10, %s3896_s15), 3 }
  0x16   : > { %s3897_s28 = sshll.u32 %s5096_s15, 3  ;;  %s5041_s15 = scalar_lea.sflag [#allocation3], %s243_s20 }
  0x17   : > { %s250_s10 = scalar_lea.vmem %s5082_s0, %s3897_s28  ;;  %s4564_s28 = smov 16  }
  0x18   : > { %v253_v9 = vld [vmem:[%s250_s10] sm:$0xff]  ;;  %v254_v10 = vld [vmem:[%s250_s10 + $0x8] sm:$0xff] }
  0x19   : > { %4094 = vmatprep.mubr.msk.f32.mxu1 %vm277_vm0, %v253_v9  ;;  %4087 = vmatprep.mubr.msk.f32.mxu0 %vm277_vm0, %v253_v9 }
  0x1a   : > { %4095 = vmatmul.mubr.msk.f32.vlgmr.msra.gmra.mrb[0].mxu1 %vm277_vm0, %v254_v10  ;;  %4088 = vmatmul.mubr.msk.f32.vlgmr.msra.gmra.mrb[0].mxu0 %vm277_vm0, %v254_v10 }
  0x1b   : > { %4331 = vmatpush3.bf16.msra.mxu0 %v4328_v8  ;;  %4101 = vmatprep.mubr.msk.f32.mxu0 %vm277_vm0, %v253_v9 }
  0x1c   : > { %4109 = vmatprep.subr.mxu0 %v4556_v11  ;;  %4106 = vmatprep.mubr.msk.f32.mxu1 %vm4557_vm1, %v4556_v11 }
  0x1e   : > { %4102 = vmatmul.mubr.msk.f32.vlgmr.msra.gmra.mrb[2].mxu0 %vm277_vm0, %v254_v10 }
  0x1f   : > { %4111 = vmatprep.mubr.msk.f32.mxu0 %vm4557_vm1, %v4556_v11 }
  0xed   : > { %v4685_v12 = vpop.f32.mrb[0].mxu1  ;;  %v4089_v13 = vpop.f32.mrb[0].mxu0 }
  0xee   : > { %912 = vrot.lane.b32.xlu1 %v4685_v12, %s4558_s11  ;;  %v4689_v14 = vmul.f32 0.25, %v4089_v13  ;;  %v4691_v15 = vpop.f32.mrb[1].mxu1  ;;  %4110 = vmatpush3.xpose.msk.msra.mxu0 %vm277_vm0, %v4685_v12  ;;  %v350_v16 = vpop.f32.mrb[1].mxu0 }
  0xef   : > { %v4695_v17 = vmul.f32 0.25, %v350_v16  ;;  %4105 = vmatpush3.xpose.msk.msra.mxu1 %vm277_vm0, %v4691_v15  ;;  %4119 = vmatprep.subr.mxu0 %v4556_v11 }
  0xf0   : > { %4114 = vmatprep.subr.mxu1 %v4556_v11 }
  0xf1   : > { %4112 = vmatmul.mubr.msk.f32.vlgmr.msra.gmra.mrb[4].mxu0 %vm277_vm0, %v4689_v14  ;;  %v4703_v18 = vpop.f32.mrb[2].mxu0 }
  0xf2   : > { %910 = vrot.lane.b32.xlu1 %v4689_v14, %s4558_s11  ;;  %4107 = vmatmul.mubr.msk.f32.vlgmr.msra.gmra.mrb[2].mxu1 %vm277_vm0, %v4695_v17  ;;  %v4709_v19 = vpop.f32.mrb[3].mxu0 }
  0xf3   : > { %4115 = vmatpush3.msra.mxu1 %v4709_v19  ;;  %4120 = vmatpush3.msra.mxu0 %v4703_v18 }
  0xf4   : > { %4121 = vmatprep.mubr.msk.f32.mxu0 %vm4557_vm1, %v4556_v11  ;;  %4129 = vmatprep.subr.mxu0 %v4556_v11 }
  0xf5   : > { %4116 = vmatprep.mubr.msk.f32.mxu1 %vm4557_vm1, %v4556_v11  ;;  %4124 = vmatprep.subr.mxu1 %v4556_v11 }
 0x160   : > { %v913_v36 = vpop.permute.xlu1 %912 }
 0x164   : > { %v911_v38 = vpop.permute.xlu1 %910 }
 0x1c4   : > { %v659_v20 = vpop.f32.mrb[4].mxu0 }
 0x1c5   : > { %v583_v21 = vpop.f32.mrb[2].mxu1  ;;  %v4113_v22 = vpop.f32.mrb[5].mxu0  ;;  %v667_v23 = vsel %vm663_vm2, %v659_v20, -inf }
 0x1c6   : > { %668 = vmax.xlane.f32.xlu0 %v667_v23  ;;  %v4108_v24 = vpop.f32.mrb[3].mxu1  ;;  %v664_v30 = vsel %vm663_vm2, %v583_v21, -inf }
 0x253   : > { %v669_v25 = vpop.xlane.xlu0 %668 }
 0x254   : > { %v671_v26 = vsub.f32 %v659_v20, %v669_v25 }
 0x256   : > { %v674_v27 = vmul.f32 1.442695, %v671_v26 }
 0x258   : > { %4428 = vpow2.f32 %v674_v27 }
 0x262   : > { %v4429_v28 = vpop.eup %4428 }
 0x263   : > { %v679_v29 = vsel %vm663_vm2, %v4429_v28, 0.0 }
 0x264   : > { %680 = vadd.xlane.f32.xlu0 %v679_v29  ;;  %v263_v29 = vld [vmem:[%s5086_s4 + $0x10] sm:$0xff] }
 0x268   : > { %665 = vmax.xlane.f32.xlu0 %v664_v30  ;;  %v264_v30 = vld [vmem:[%s5086_s4 + $0x18] sm:$0xff] }
 0x27e   : > { %834 = vrot.lane.b32.xlu0 %v4691_v15, %s4558_s11 }
 0x282   : > { %832 = vrot.lane.b32.xlu0 %v4695_v17, %s4558_s11 }
 0x2f1   : > { %v681_v31 = vpop.xlane.xlu0 %680 }
 0x2f2   : > { %4430 = vrcp.f32 %v681_v31  ;;  %v4332_v31 = vpack.c.bf16 %v264_v30, %v263_v29 }
 0x2f5   : > { %v666_v32 = vpop.xlane.xlu0 %665 }
 0x2f6   : > { %v670_v33 = vsub.f32 %v583_v21, %v666_v32  ;;  %v261_v32 = vld [vmem:[%s5086_s4] sm:$0xff] }
 0x2f8   : > { %v672_v34 = vmul.f32 1.442695, %v670_v33  ;;  %v262_v33 = vld [vmem:[%s5086_s4 + $0x8] sm:$0xff] }
 0x2f9   : > { %v835_v44 = vpop.permute.xlu0 %834 }
 0x2fa   : > { %4432 = vpow2.f32 %v672_v34  ;;  %v4336_v34 = vpack.c.bf16 %v262_v33, %v261_v32 }
 0x2fc   : > { %v4431_v35 = vpop.eup %4430 }
 0x2fd   : > { %v685_v37 = vmul.f32 %v4431_v35, %v4429_v28  ;;  %v833_v46 = vpop.permute.xlu0 %832 }
 0x2ff   : > { %4122 = vmatmul.mubr.msk.f32.vlgmr.msra.gmra.mrb[6].mxu0 %vm663_vm2, %v685_v37 }
 0x300   : > { %4130 = vmatpush3.xpose.msk.msra.mxu0 %vm277_vm0, %v913_v36  ;;  %4131 = vmatprep.mubr.msk.f32.mxu0 %vm4557_vm1, %v4556_v11 }
 0x301   : > { %4139 = vmatprep.subr.mxu0 %v4556_v11 }
 0x303   : > { %4132 = vmatmul.mubr.msk.f32.vlgmr.msra.gmra.mrb[8].mxu0 %vm277_vm0, %v911_v38 }
 0x304   : > { %v4433_v39 = vpop.eup %4432  ;;  %4141 = vmatprep.mubr.msk.f32.mxu0 %vm4557_vm1, %v4556_v11 }
 0x305   : > { %v676_v40 = vsel %vm663_vm2, %v4433_v39, 0.0 }
 0x306   : > { %677 = vadd.xlane.f32.xlu1 %v676_v40 }
 0x317   : > { %1088 = vrot.lane.b32.xlu1 %v4703_v18, %s4558_s11 }
 0x31b   : > { %1328 = vrot.lane.b32.xlu1 %v4691_v15, %s4559_s12 }
 0x31f   : > { %1406 = vrot.lane.b32.xlu1 %v4685_v12, %s4559_s12 }
 0x393   : > { %v678_v41 = vpop.xlane.xlu1 %677 }
 0x394   : > { %4434 = vrcp.f32 %v678_v41 }
 0x397   : > { %v1089_v42 = vpop.permute.xlu1 %1088 }
 0x398   : > { %4140 = vmatpush3.msra.mxu0 %v1089_v42 }
 0x399   : > { %4158 = vmatprep.subr.mxu0 %v4556_v11 }
 0x39b   : > { %v1329_v62 = vpop.permute.xlu1 %1328 }
 0x39e   : > { %v4435_v43 = vpop.eup %4434 }
 0x39f   : > { %v684_v45 = vmul.f32 %v4435_v43, %v4433_v39  ;;  %v1407_v63 = vpop.permute.xlu1 %1406 }
 0x3a1   : > { %4117 = vmatmul.mubr.msk.f32.vlgmr.msra.gmra.mrb[4].mxu1 %vm663_vm2, %v684_v45 }
 0x3a2   : > { %4125 = vmatpush3.xpose.msk.msra.mxu1 %vm277_vm0, %v835_v44  ;;  %4126 = vmatprep.mubr.msk.f32.mxu1 %vm4557_vm1, %v4556_v11 }
 0x3a3   : > { %4134 = vmatprep.subr.mxu1 %v4556_v11 }
 0x3a5   : > { %4127 = vmatmul.mubr.msk.f32.vlgmr.msra.gmra.mrb[6].mxu1 %vm277_vm0, %v833_v46 }
 0x3a6   : > { %4136 = vmatprep.mubr.msk.f32.mxu1 %vm4557_vm1, %v4556_v11 }
 0x3d2   : > { %v4750_v47 = vpop.f32.mrb[6].mxu0 }
 0x3d3   : > { %v4123_v48 = vpop.f32.mrb[7].mxu0 }
 0x3d4   : > { %v265_v48 = vld [vmem:[%s5086_s4 + $0x20] sm:$0xff] }
 0x3d6   : > { %v984_v49 = vpop.f32.mrb[8].mxu0 }
 0x3d7   : > { %v4133_v50 = vpop.f32.mrb[9].mxu0  ;;  %v991_v51 = vsel %vm663_vm2, %v984_v49, -inf }
 0x3d8   : > { %992 = vmax.xlane.f32.xlu0 %v991_v51 }
 0x3ee   : > { %1326 = vrot.lane.b32.xlu0 %v4695_v17, %s4559_s12 }
 0x465   : > { %v993_v52 = vpop.xlane.xlu0 %992 }
 0x466   : > { %v995_v53 = vsub.f32 %v984_v49, %v993_v52  ;;  %v266_v49 = vld [vmem:[%s5086_s4 + $0x28] sm:$0xff] }
 0x467   : > { %v4340_v51 = vpack.c.bf16 %v266_v49, %v265_v48  ;;  %v268_v48 = vld [vmem:[%s5086_s4 + $0x38] sm:$0xff] }
 0x468   : > { %v998_v54 = vmul.f32 1.442695, %v995_v53 }
 0x469   : > { %v1327_v3 = vpop.permute.xlu0 %1326 }
 0x46a   : > { %4436 = vpow2.f32 %v998_v54 }
 0x474   : > { %v4437_v55 = vpop.eup %4436  ;;  %v4755_v56 = vpop.f32.mrb[4].mxu1 }
 0x475   : > { %v4118_v57 = vpop.f32.mrb[5].mxu1  ;;  %v1003_v58 = vsel %vm663_vm2, %v4437_v55, 0.0 }
 0x476   : > { %1004 = vadd.xlane.f32.xlu1 %v1003_v58 }
 0x478   : > { %v906_v59 = vpop.f32.mrb[6].mxu1 }
 0x479   : > { %v4128_v60 = vpop.f32.mrb[7].mxu1  ;;  %v988_v61 = vsel %vm663_vm2, %v906_v59, -inf }
 0x487   : > { %1404 = vrot.lane.b32.xlu1 %v4689_v14, %s4559_s12 }
 0x4ab   : > { %989 = vmax.xlane.f32.xlu1 %v988_v61 }
 0x4bc   : > { %1011 = vrot.lane.b32.xlu1 %v4709_v19, %s4558_s11  ;;  %s4561_s11 = smov 64  }
 0x503   : > { %v1005_v0 = vpop.xlane.xlu1 %1004 }
 0x504   : > { %4438 = vrcp.f32 %v1005_v0 }
 0x507   : > { %v1405_v4 = vpop.permute.xlu1 %1404 }
 0x50e   : > { %v4439_v1 = vpop.eup %4438 }
 0x50f   : > { %v1009_v2 = vmul.f32 %v4439_v1, %v4437_v55 }
 0x511   : > { %4142 = vmatmul.mubr.msk.f32.vlgmr.msra.gmra.mrb[10].mxu0 %vm663_vm2, %v1009_v2 }
 0x512   : > { %4159 = vmatpush3.xpose.msk.msra.mxu0 %vm277_vm0, %v1329_v62  ;;  %4160 = vmatprep.mubr.msk.f32.mxu0 %vm4557_vm1, %v4556_v11 }
 0x513   : > { %4163 = vmatprep.subr.mxu0 %v4556_v11 }
 0x515   : > { %4161 = vmatmul.mubr.msk.f32.vlgmr.msra.gmra.mrb[12].mxu0 %vm277_vm0, %v1327_v3 }
 0x516   : > { %4164 = vmatpush3.xpose.msk.msra.mxu0 %vm277_vm0, %v1407_v63  ;;  %4165 = vmatprep.mubr.msk.f32.mxu0 %vm4557_vm1, %v4556_v11 }
 0x517   : > { %4173 = vmatprep.subr.mxu0 %v4556_v11 }
 0x519   : > { %4166 = vmatmul.mubr.msk.f32.vlgmr.msra.gmra.mrb[14].mxu0 %vm277_vm0, %v1405_v4 }
 0x51a   : > { %4175 = vmatprep.mubr.msk.f32.mxu0 %vm4557_vm1, %v4556_v11 }
 0x538   : > { %v990_v5 = vpop.xlane.xlu1 %989 }
 0x539   : > { %v994_v6 = vsub.f32 %v906_v59, %v990_v5 }
 0x53b   : > { %v996_v7 = vmul.f32 1.442695, %v994_v6 }
 0x53c   : > { %v1012_v8 = vpop.permute.xlu1 %1011 }
 0x53d   : > { %4440 = vpow2.f32 %v996_v7  ;;  %4135 = vmatpush3.msra.mxu1 %v1012_v8 }
 0x53e   : > { %4333 = vmatprep.subr.bf16.mxu1 %v4332_v31 }
 0x547   : > { %v4441_v9 = vpop.eup %4440 }
 0x548   : > { %v1000_v10 = vsel %vm663_vm2, %v4441_v9, 0.0 }
 0x549   : > { %1001 = vadd.xlane.f32.xlu0 %v1000_v10 }
 0x5d6   : > { %v1002_v13 = vpop.xlane.xlu0 %1001 }
 0x5d7   : > { %4442 = vrcp.f32 %v1002_v13 }
 0x5e1   : > { %v4443_v16 = vpop.eup %4442 }
 0x5e2   : > { %v1008_v20 = vmul.f32 %v4443_v16, %v4441_v9 }
 0x5e4   : > { %4137 = vmatmul.mubr.msk.f32.vlgmr.msra.gmra.mrb[8].mxu1 %vm663_vm2, %v1008_v20  ;;  %v1160_v21 = vpop.f32.mrb[10].mxu0 }
 0x5e5   : > { %v4143_v22 = vpop.f32.mrb[11].mxu0  ;;  %4335 = vmatpush3.bf16.msra.mxu1 %v4332_v31 }
 0x5e6   : > { %4337 = vmatprep.subr.bf16.mxu1 %v4336_v34 }
 0x5e8   : > { %v1400_v23 = vpop.f32.mrb[12].mxu0 }
 0x5e9   : > { %v4162_v24 = vpop.f32.mrb[13].mxu0  ;;  %v1482_v25 = vsel %vm663_vm2, %v1400_v23, -inf }
 0x5ea   : > { %1483 = vmax.xlane.f32.xlu0 %v1482_v25 }
 0x5ec   : > { %v1478_v26 = vpop.f32.mrb[14].mxu0 }
 0x5ed   : > { %v4167_v27 = vpop.f32.mrb[15].mxu0  ;;  %v1485_v28 = vsel %vm663_vm2, %v1478_v26, -inf }
 0x5ee   : > { %1486 = vmax.xlane.f32.xlu0 %v1485_v28 }
 0x677   : > { %v1484_v35 = vpop.xlane.xlu0 %1483 }
 0x678   : > { %v1488_v36 = vsub.f32 %v1400_v23, %v1484_v35 }
 0x67a   : > { %v1490_v37 = vmul.f32 1.442695, %v1488_v36 }
 0x67b   : > { %v1487_v38 = vpop.xlane.xlu0 %1486 }
 0x67c   : > { %4444 = vpow2.f32 %v1490_v37  ;;  %v1489_v39 = vsub.f32 %v1478_v26, %v1487_v38 }
 0x67e   : > { %v1492_v40 = vmul.f32 1.442695, %v1489_v39 }
 0x680   : > { %4446 = vpow2.f32 %v1492_v40 }
 0x686   : > { %v4445_v41 = vpop.eup %4444 }
 0x687   : > { %v1494_v42 = vsel %vm663_vm2, %v4445_v41, 0.0 }
 0x688   : > { %1495 = vadd.xlane.f32.xlu0 %v1494_v42 }
 0x68a   : > { %v4447_v43 = vpop.eup %4446 }
 0x68b   : > { %v1497_v44 = vsel %vm663_vm2, %v4447_v43, 0.0 }
 0x68c   : > { %1498 = vadd.xlane.f32.xlu1 %v1497_v44 }
 0x69d   : > { %1819 = vrot.lane.b32.xlu1 %v4685_v12, %s4560_s26 }
 0x69e   : > { %1504 = vrot.lane.b32.xlu0 %v4709_v19, %s4559_s12 }
 0x6a2   : > { %1580 = vrot.lane.b32.xlu0 %v4703_v18, %s4559_s12  ;;  %s4562_s12 = smov 48  }
 0x6a6   : > { %1741 = vrot.lane.b32.xlu0 %v4691_v15, %s4560_s26 }
 0x6aa   : > { %1739 = vrot.lane.b32.xlu0 %v4695_v17, %s4560_s26 }
 0x6ae   : > { %1817 = vrot.lane.b32.xlu0 %v4689_v14, %s4560_s26 }
 0x6b7   : > { %v1083_v45 = vpop.f32.mrb[8].mxu1 }
 0x6b8   : > { %v4138_v46 = vpop.f32.mrb[9].mxu1  ;;  %4148 = vmatprep.mubr.msk.f32.mxu1 %vm277_vm0, %v1083_v45 }
 0x6b9   : > { %4149 = vmatmul.mubr.msk.f32.vlgmr.msra.gmra.mrb[10].mxu1 %vm277_vm0, %v1160_v21  ;;  %v267_v46 = vld [vmem:[%s5086_s4 + $0x30] sm:$0xff] }
 0x6ba   : > { %4155 = vmatprep.mubr.msk.f32.mxu1 %vm277_vm0, %v4755_v56  ;;  %4339 = vmatpush3.bf16.msra.mxu1 %v4336_v34  ;;  %v4344_v49 = vpack.c.bf16 %v268_v48, %v267_v46 }
 0x6bb   : > { %4168 = vmatprep.subr.mxu1 %v4556_v11 }
 0x6c1   : > { %4156 = vmatmul.mubr.msk.f32.vlgmr.msra.gmra.mrb[10].mxu1 %vm277_vm0, %v4750_v47 }
 0x6c2   : > { %4170 = vmatprep.mubr.msk.f32.mxu1 %vm4557_vm1, %v4556_v11 }
 0x715   : > { %v1496_v50 = vpop.xlane.xlu0 %1495 }
 0x716   : > { %4448 = vrcp.f32 %v1496_v50 }
 0x719   : > { %v1505_v52 = vpop.permute.xlu0 %1504  ;;  %v1499_v53 = vpop.xlane.xlu1 %1498 }
 0x71a   : > { %4450 = vrcp.f32 %v1499_v53  ;;  %4169 = vmatpush3.msra.mxu1 %v1505_v52 }
 0x71b   : > { %4341 = vmatprep.subr.bf16.mxu1 %v4340_v51 }
 0x71d   : > { %v1581_v47 = vpop.permute.xlu0 %1580  ;;  %v1820_v63 = vpop.permute.xlu1 %1819 }
 0x71e   : > { %4174 = vmatpush3.msra.mxu0 %v1581_v47 }
 0x71f   : > { %4185 = vmatprep.subr.mxu0 %v4556_v11 }
 0x720   : > { %v4449_v54 = vpop.eup %4448 }
 0x721   : > { %v1502_v55 = vmul.f32 %v4449_v54, %v4445_v41  ;;  %v1742_v57 = vpop.permute.xlu0 %1741 }
 0x723   : > { %4171 = vmatmul.mubr.msk.f32.vlgmr.msra.gmra.mrb[12].mxu1 %vm663_vm2, %v1502_v55 }
 0x724   : > { %v4451_v56 = vpop.eup %4450  ;;  %4343 = vmatpush3.bf16.msra.mxu1 %v4340_v51 }
 0x725   : > { %v1503_v58 = vmul.f32 %v4451_v56, %v4447_v43  ;;  %4190 = vmatprep.subr.mxu1 %v4556_v11  ;;  %v1740_v59 = vpop.permute.xlu0 %1739 }
 0x727   : > { %4176 = vmatmul.mubr.msk.f32.vlgmr.msra.gmra.mrb[16].mxu0 %vm663_vm2, %v1503_v58 }
 0x728   : > { %4186 = vmatpush3.xpose.msk.msra.mxu0 %vm277_vm0, %v1742_v57  ;;  %4187 = vmatprep.mubr.msk.f32.mxu0 %vm4557_vm1, %v4556_v11 }
 0x729   : > { %4195 = vmatprep.subr.mxu0 %v4556_v11  ;;  %v1818_v1 = vpop.permute.xlu0 %1817 }
 0x72b   : > { %4188 = vmatmul.mubr.msk.f32.vlgmr.msra.gmra.mrb[18].mxu0 %vm277_vm0, %v1740_v59 }
 0x72c   : > { %4197 = vmatprep.mubr.msk.f32.mxu0 %vm4557_vm1, %v4556_v11 }
 0x7f6   : > { %v1576_v60 = vpop.f32.mrb[12].mxu1 }
 0x7f7   : > { %v4172_v61 = vpop.f32.mrb[13].mxu1  ;;  %4182 = vmatprep.mubr.msk.f32.mxu1 %vm277_vm0, %v1576_v60 }
 0x7fa   : > { %v1652_v62 = vpop.f32.mrb[16].mxu0 }
 0x7fb   : > { %v4177_v0 = vpop.f32.mrb[17].mxu0  ;;  %4183 = vmatmul.mubr.msk.f32.vlgmr.msra.gmra.mrb[10].mxu1 %vm277_vm0, %v1652_v62  ;;  %v269_v62 = vld [vmem:[%s5086_s4 + $0x40] sm:$0xff] }
 0x7fc   : > { %4191 = vmatpush3.xpose.msk.msra.mxu1 %vm277_vm0, %v1820_v63  ;;  %4192 = vmatprep.mubr.msk.f32.mxu1 %vm4557_vm1, %v4556_v11  ;;  %v270_v63 = vld [vmem:[%s5086_s4 + $0x48] sm:$0xff] }
 0x7fd   : > { %4200 = vmatprep.subr.mxu1 %v4556_v11 }
 0x7fe   : > { %v1813_v2 = vpop.f32.mrb[18].mxu0 }
 0x7ff   : > { %v4189_v3 = vpop.f32.mrb[19].mxu0  ;;  %4193 = vmatmul.mubr.msk.f32.vlgmr.msra.gmra.mrb[14].mxu1 %vm277_vm0, %v1818_v1  ;;  %v1895_v4 = vsel %vm663_vm2, %v1813_v2, -inf  ;;  %v4348_v1 = vpack.c.bf16 %v270_v63, %v269_v62 }
 0x800   : > { %1896 = vmax.xlane.f32.xlu0 %v1895_v4  ;;  %4202 = vmatprep.mubr.msk.f32.mxu1 %vm4557_vm1, %v4556_v11 }
 0x816   : > { %1917 = vrot.lane.b32.xlu0 %v4709_v19, %s4560_s26 }
 0x81a   : > { %2152 = vrot.lane.b32.xlu0 %v4695_v17, %s4561_s11 }
 0x81e   : > { %2232 = vrot.lane.b32.xlu0 %v4685_v12, %s4561_s11 }
 0x822   : > { %2230 = vrot.lane.b32.xlu0 %v4689_v14, %s4561_s11 }
 0x88d   : > { %v1897_v5 = vpop.xlane.xlu0 %1896 }
 0x88e   : > { %v1901_v6 = vsub.f32 %v1813_v2, %v1897_v5 }
 0x890   : > { %v1903_v7 = vmul.f32 1.442695, %v1901_v6 }
 0x891   : > { %v1918_v8 = vpop.permute.xlu0 %1917 }
 0x892   : > { %4452 = vpow2.f32 %v1903_v7  ;;  %4196 = vmatpush3.msra.mxu0 %v1918_v8 }
 0x893   : > { %4212 = vmatprep.subr.mxu0 %v4556_v11 }
 0x895   : > { %v2153_v22 = vpop.permute.xlu0 %2152 }
 0x899   : > { %v2233_v26 = vpop.permute.xlu0 %2232 }
 0x89c   : > { %v4453_v9 = vpop.eup %4452 }
 0x89d   : > { %v1907_v10 = vsel %vm663_vm2, %v4453_v9, 0.0  ;;  %v2231_v27 = vpop.permute.xlu0 %2230 }
 0x89e   : > { %1908 = vadd.xlane.f32.xlu1 %v1907_v10 }
 0x8af   : > { %2154 = vrot.lane.b32.xlu1 %v4691_v15, %s4561_s11 }
 0x8d2   : > { %v1891_v13 = vpop.f32.mrb[14].mxu1 }
 0x8d3   : > { %v4194_v16 = vpop.f32.mrb[15].mxu1  ;;  %v1898_v20 = vsel %vm663_vm2, %v1891_v13, -inf }
 0x8d4   : > { %1899 = vmax.xlane.f32.xlu1 %v1898_v20 }
 0x92b   : > { %v1909_v21 = vpop.xlane.xlu1 %1908 }
 0x92c   : > { %4454 = vrcp.f32 %v1909_v21 }
 0x92f   : > { %v2155_v25 = vpop.permute.xlu1 %2154 }
 0x936   : > { %v4455_v23 = vpop.eup %4454 }
 0x937   : > { %v1915_v24 = vmul.f32 %v4455_v23, %v4453_v9 }
 0x939   : > { %4198 = vmatmul.mubr.msk.f32.vlgmr.msra.gmra.mrb[20].mxu0 %vm663_vm2, %v1915_v24 }
 0x93a   : > { %4213 = vmatpush3.xpose.msk.msra.mxu0 %vm277_vm0, %v2155_v25  ;;  %4214 = vmatprep.mubr.msk.f32.mxu0 %vm4557_vm1, %v4556_v11 }
 0x93b   : > { %4217 = vmatprep.subr.mxu0 %v4556_v11 }
 0x93d   : > { %4215 = vmatmul.mubr.msk.f32.vlgmr.msra.gmra.mrb[22].mxu0 %vm277_vm0, %v2153_v22 }
 0x93e   : > { %4218 = vmatpush3.xpose.msk.msra.mxu0 %vm277_vm0, %v2233_v26  ;;  %4219 = vmatprep.mubr.msk.f32.mxu0 %vm4557_vm1, %v4556_v11 }
 0x93f   : > { %4227 = vmatprep.subr.mxu0 %v4556_v11 }
 0x941   : > { %4220 = vmatmul.mubr.msk.f32.vlgmr.msra.gmra.mrb[24].mxu0 %vm277_vm0, %v2231_v27 }
 0x942   : > { %4229 = vmatprep.mubr.msk.f32.mxu0 %vm4557_vm1, %v4556_v11 }
 0x961   : > { %v1900_v28 = vpop.xlane.xlu1 %1899 }
 0x962   : > { %v1902_v29 = vsub.f32 %v1891_v13, %v1900_v28 }
 0x964   : > { %v1905_v30 = vmul.f32 1.442695, %v1902_v29 }
 0x966   : > { %4456 = vpow2.f32 %v1905_v30 }
 0x970   : > { %v4457_v31 = vpop.eup %4456 }
 0x971   : > { %v1910_v32 = vsel %vm663_vm2, %v4457_v31, 0.0 }
 0x972   : > { %1911 = vadd.xlane.f32.xlu0 %v1910_v32 }
 0x988   : > { %1993 = vrot.lane.b32.xlu0 %v4703_v18, %s4560_s26  ;;  %s3895_s26 = sshll.u32 %s243_s20, 4 }
 0x989   : > { %s245_s9 = scalar_lea.vmem [#allocation2], %s3895_s26 }
 0x98a   : > { %s3829_s10 = sshll.u32 %s245_s9, 4  ;;  %s5032_s10 = int_to_ptr.vmem [resolvable:$true] %s3829_s10 }
 0x98c   : > { %2406 = vrot.lane.b32.xlu0 %v4703_v18, %s4561_s11 }
 0x990   : > { %2567 = vrot.lane.b32.xlu0 %v4691_v15, %s4562_s12 }
 0x994   : > { %2565 = vrot.lane.b32.xlu0 %v4695_v17, %s4562_s12 }
 0x998   : > { %2645 = vrot.lane.b32.xlu0 %v4685_v12, %s4562_s12 }
 0x9ff   : > { %v1912_v33 = vpop.xlane.xlu0 %1911 }
 0xa00   : > { %4458 = vrcp.f32 %v1912_v33 }
 0xa03   : > { %v1994_v34 = vpop.permute.xlu0 %1993 }
 0xa04   : > { %4201 = vmatpush3.msra.mxu1 %v1994_v34 }
 0xa05   : > { %4345 = vmatprep.subr.bf16.mxu1 %v4344_v49 }
 0xa07   : > { %v2407_v35 = vpop.permute.xlu0 %2406 }
 0xa08   : > { %4228 = vmatpush3.msra.mxu0 %v2407_v35 }
 0xa09   : > { %4239 = vmatprep.subr.mxu0 %v4556_v11 }
 0xa0a   : > { %v4459_v36 = vpop.eup %4458 }
 0xa0b   : > { %v1916_v37 = vmul.f32 %v4459_v36, %v4457_v31  ;;  %v2568_v6 = vpop.permute.xlu0 %2567 }
 0xa0c   : > { %v1989_v38 = vpop.f32.mrb[20].mxu0 }
 0xa0d   : > { %v4199_v39 = vpop.f32.mrb[21].mxu0  ;;  %4203 = vmatmul.mubr.msk.f32.vlgmr.msra.gmra.mrb[16].mxu1 %vm663_vm2, %v1916_v37 }
 0xa0e   : > { %4209 = vmatprep.mubr.msk.f32.mxu1 %vm277_vm0, %v1989_v38  ;;  %4347 = vmatpush3.bf16.msra.mxu1 %v4344_v49 }
 0xa0f   : > { %4222 = vmatprep.subr.mxu1 %v4556_v11  ;;  %v2566_v8 = vpop.permute.xlu0 %2565 }
 0xa10   : > { %v2226_v40 = vpop.f32.mrb[22].mxu0 }
 0xa11   : > { %v4216_v41 = vpop.f32.mrb[23].mxu0  ;;  %v2308_v42 = vsel %vm663_vm2, %v2226_v40, -inf }
 0xa12   : > { %2309 = vmax.xlane.f32.xlu1 %v2308_v42 }
 0xa13   : > { %v2646_v16 = vpop.permute.xlu0 %2645 }
 0xa14   : > { %v2304_v43 = vpop.f32.mrb[24].mxu0 }
 0xa15   : > { %v4221_v44 = vpop.f32.mrb[25].mxu0  ;;  %v2311_v45 = vsel %vm663_vm2, %v2304_v43, -inf }
 0xa16   : > { %2312 = vmax.xlane.f32.xlu1 %v2311_v45 }
 0xa9f   : > { %v2310_v50 = vpop.xlane.xlu1 %2309 }
 0xaa0   : > { %v2314_v51 = vsub.f32 %v2226_v40, %v2310_v50 }
 0xaa2   : > { %v2316_v52 = vmul.f32 1.442695, %v2314_v51 }
 0xaa3   : > { %v2313_v53 = vpop.xlane.xlu1 %2312 }
 0xaa4   : > { %4460 = vpow2.f32 %v2316_v52  ;;  %v2315_v47 = vsub.f32 %v2304_v43, %v2313_v53 }
 0xaa6   : > { %v2318_v54 = vmul.f32 1.442695, %v2315_v47 }
 0xaa8   : > { %4462 = vpow2.f32 %v2318_v54 }
 0xaae   : > { %v4461_v55 = vpop.eup %4460 }
 0xaaf   : > { %v2320_v56 = vsel %vm663_vm2, %v4461_v55, 0.0 }
 0xab0   : > { %2321 = vadd.xlane.f32.xlu1 %v2320_v56  ;;  %v271_v56 = vld [vmem:[%s5086_s4 + $0x50] sm:$0xff] }
 0xab2   : > { %v4463_v57 = vpop.eup %4462 }
 0xab3   : > { %v2323_v58 = vsel %vm663_vm2, %v4463_v57, 0.0 }
 0xab4   : > { %2324 = vadd.xlane.f32.xlu1 %v2323_v58 }
 0xac5   : > { %2330 = vrot.lane.b32.xlu1 %v4709_v19, %s4561_s11  ;;  %s3974_s11 = sshll.u32 %s4624_s25, 8  ;;  %s4492_s25 = scalar_lea.vmem %s5032_s10, 256 }
 0xac6   : > { %s5037_s14 = scalar_lea.hbm %s5088_s6, %s3974_s11  ;;  %p4493_p11 = scmp.ne.s32.totalorder %s5032_s10, %s4492_s25 }
 0xac8   : > { %p4494_p12 = pnand %p4493_p11, %p4641_p5 }
 0xac9   : > { %2643 = vrot.lane.b32.xlu1 %v4689_v14, %s4562_s12 }
 0xaca   : > { %p4495_p13 = pneg %p4494_p12 }
 0xacd   : > { %2980 = vrot.lane.b32.xlu1 %v4691_v15, %s4563_s17 }
 0xae0   : > { %v2065_v59 = vpop.f32.mrb[16].mxu1 }
 0xae1   : > { %v4204_v60 = vpop.f32.mrb[17].mxu1  ;;  %4210 = vmatmul.mubr.msk.f32.vlgmr.msra.gmra.mrb[10].mxu1 %vm277_vm0, %v2065_v59 }
 0xae2   : > { %4224 = vmatprep.mubr.msk.f32.mxu1 %vm4557_vm1, %v4556_v11 }
 0xb3d   : > { %v2322_v61 = vpop.xlane.xlu1 %2321 }
 0xb3e   : > { %4464 = vrcp.f32 %v2322_v61 }
 0xb41   : > { %v2325_v0 = vpop.xlane.xlu1 %2324 }
 0xb42   : > { %4466 = vrcp.f32 %v2325_v0 }
 0xb45   : > { %v2331_v2 = vpop.permute.xlu1 %2330 }
 0xb46   : > { %4223 = vmatpush3.msra.mxu1 %v2331_v2 }
 0xb47   : > { %4349 = vmatprep.subr.bf16.mxu1 %v4348_v1 }
 0xb48   : > { %v4465_v3 = vpop.eup %4464 }
 0xb49   : > { %v2328_v4 = vmul.f32 %v4465_v3, %v4461_v55  ;;  %v2644_v21 = vpop.permute.xlu1 %2643 }
 0xb4b   : > { %4225 = vmatmul.mubr.msk.f32.vlgmr.msra.gmra.mrb[18].mxu1 %vm663_vm2, %v2328_v4 }
 0xb4c   : > { %v4467_v5 = vpop.eup %4466  ;;  %4351 = vmatpush3.bf16.msra.mxu1 %v4348_v1 }
 0xb4d   : > { %v2329_v7 = vmul.f32 %v4467_v5, %v4463_v57  ;;  %4244 = vmatprep.subr.mxu1 %v4556_v11  ;;  %v2981_v34 = vpop.permute.xlu1 %2980  ;;  %v272_v57 = vld [vmem:[%s5086_s4 + $0x58] sm:$0xff] }
 0xb4e   : > { %v4352_v58 = vpack.c.bf16 %v272_v57, %v271_v56  ;;  %v3968_v56 = vld [vmem:[%s5087_s5] ss:$0 sm:$0xff] }
 0xb4f   : > { %4230 = vmatmul.mubr.msk.f32.vlgmr.msra.gmra.mrb[26].mxu0 %vm663_vm2, %v2329_v7 }
 0xb50   : > { %4240 = vmatpush3.xpose.msk.msra.mxu0 %vm277_vm0, %v2568_v6  ;;  %4241 = vmatprep.mubr.msk.f32.mxu0 %vm4557_vm1, %v4556_v11 }
 0xb51   : > { %4249 = vmatprep.subr.mxu0 %v4556_v11 }
 0xb53   : > { %4242 = vmatmul.mubr.msk.f32.vlgmr.msra.gmra.mrb[28].mxu0 %vm277_vm0, %v2566_v8  ;;  %v273_v8 = vld [vmem:[%s5086_s4 + $0x60] sm:$0xff] }
 0xb54   : > { %4251 = vmatprep.mubr.msk.f32.mxu0 %vm4557_vm1, %v4556_v11 }
 0xc1e   : > { %v2402_v9 = vpop.f32.mrb[18].mxu1 }
 0xc1f   : > { %v4226_v10 = vpop.f32.mrb[19].mxu1  ;;  %4236 = vmatprep.mubr.msk.f32.mxu1 %vm277_vm0, %v2402_v9  ;;  %v274_v9 = vld [vmem:[%s5086_s4 + $0x68] sm:$0xff] }
 0xc22   : > { %v2478_v13 = vpop.f32.mrb[26].mxu0 }
 0xc23   : > { %v4231_v20 = vpop.f32.mrb[27].mxu0  ;;  %4237 = vmatmul.mubr.msk.f32.vlgmr.msra.gmra.mrb[10].mxu1 %vm277_vm0, %v2478_v13 }
 0xc24   : > { %4245 = vmatpush3.xpose.msk.msra.mxu1 %vm277_vm0, %v2646_v16  ;;  %4246 = vmatprep.mubr.msk.f32.mxu1 %vm4557_vm1, %v4556_v11 }
 0xc25   : > { %4254 = vmatprep.subr.mxu1 %v4556_v11 }
 0xc26   : > { %v2639_v22 = vpop.f32.mrb[28].mxu0 }
 0xc27   : > { %v4243_v23 = vpop.f32.mrb[29].mxu0  ;;  %4247 = vmatmul.mubr.msk.f32.vlgmr.msra.gmra.mrb[20].mxu1 %vm277_vm0, %v2644_v21  ;;  %v2721_v24 = vsel %vm663_vm2, %v2639_v22, -inf }
 0xc28   : > { %2722 = vmax.xlane.f32.xlu0 %v2721_v24  ;;  %4256 = vmatprep.mubr.msk.f32.mxu1 %vm4557_vm1, %v4556_v11 }
 0xc3e   : > { %2743 = vrot.lane.b32.xlu0 %v4709_v19, %s4562_s12 }
 0xc42   : > { %2978 = vrot.lane.b32.xlu0 %v4695_v17, %s4563_s17 }
 0xc46   : > { %3056 = vrot.lane.b32.xlu0 %v4689_v14, %s4563_s17 }
 0xcb5   : > { %v2723_v25 = vpop.xlane.xlu0 %2722 }
 0xcb6   : > { %v2727_v26 = vsub.f32 %v2639_v22, %v2723_v25 }
 0xcb8   : > { %v2729_v27 = vmul.f32 1.442695, %v2727_v26 }
 0xcb9   : > { %v2744_v28 = vpop.permute.xlu0 %2743 }
 0xcba   : > { %4468 = vpow2.f32 %v2729_v27  ;;  %4250 = vmatpush3.msra.mxu0 %v2744_v28 }
 0xcbb   : > { %4266 = vmatprep.subr.mxu0 %v4556_v11 }
 0xcbd   : > { %v2979_v38 = vpop.permute.xlu0 %2978 }
 0xcc1   : > { %v3057_v40 = vpop.permute.xlu0 %3056 }
 0xcc4   : > { %v4469_v29 = vpop.eup %4468 }
 0xcc5   : > { %v2733_v30 = vsel %vm663_vm2, %v4469_v29, 0.0 }
 0xcc6   : > { %2734 = vadd.xlane.f32.xlu1 %v2733_v30 }
 0xcd7   : > { %3058 = vrot.lane.b32.xlu1 %v4685_v12, %s4563_s17 }
 0xcfa   : > { %v2717_v31 = vpop.f32.mrb[20].mxu1 }
 0xcfb   : > { %v4248_v32 = vpop.f32.mrb[21].mxu1  ;;  %v2724_v33 = vsel %vm663_vm2, %v2717_v31, -inf }
 0xcfc   : > { %2725 = vmax.xlane.f32.xlu1 %v2724_v33 }
 0xd53   : > { %v2735_v35 = vpop.xlane.xlu1 %2734 }
 0xd54   : > { %4470 = vrcp.f32 %v2735_v35 }
 0xd57   : > { %v3059_v39 = vpop.permute.xlu1 %3058 }
 0xd5e   : > { %v4471_v36 = vpop.eup %4470 }
 0xd5f   : > { %v2741_v37 = vmul.f32 %v4471_v36, %v4469_v29 }
 0xd61   : > { %4252 = vmatmul.mubr.msk.f32.vlgmr.msra.gmra.mrb[30].mxu0 %vm663_vm2, %v2741_v37 }
 0xd62   : > { %4267 = vmatpush3.xpose.msk.msra.mxu0 %vm277_vm0, %v2981_v34  ;;  %4268 = vmatprep.mubr.msk.f32.mxu0 %vm4557_vm1, %v4556_v11 }
 0xd63   : > { %4271 = vmatprep.subr.mxu0 %v4556_v11 }
 0xd65   : > { %4269 = vmatmul.mubr.msk.f32.vlgmr.msra.gmra.mrb[32].mxu0 %vm277_vm0, %v2979_v38 }
 0xd66   : > { %4272 = vmatpush3.xpose.msk.msra.mxu0 %vm277_vm0, %v3059_v39  ;;  %4273 = vmatprep.mubr.msk.f32.mxu0 %vm4557_vm1, %v4556_v11 }
 0xd67   : > { %4281 = vmatprep.subr.mxu0 %v4556_v11 }
 0xd69   : > { %4274 = vmatmul.mubr.msk.f32.vlgmr.msra.gmra.mrb[34].mxu0 %vm277_vm0, %v3057_v40 }
 0xd6a   : > { %4283 = vmatprep.mubr.msk.f32.mxu0 %vm4557_vm1, %v4556_v11 }
 0xd89   : > { %v2726_v41 = vpop.xlane.xlu1 %2725 }
 0xd8a   : > { %v2728_v42 = vsub.f32 %v2717_v31, %v2726_v41 }
 0xd8c   : > { %v2731_v43 = vmul.f32 1.442695, %v2728_v42 }
 0xd8e   : > { %4472 = vpow2.f32 %v2731_v43 }
 0xd98   : > { %v4473_v44 = vpop.eup %4472 }
 0xd99   : > { %v2736_v45 = vsel %vm663_vm2, %v4473_v44, 0.0 }
 0xd9a   : > { %2737 = vadd.xlane.f32.xlu0 %v2736_v45 }
 0xdb0   : > { %2819 = vrot.lane.b32.xlu0 %v4703_v18, %s4562_s12 }
 0xdb4   : > { %3232 = vrot.lane.b32.xlu0 %v4703_v18, %s4563_s17 }
 0xdb8   : > { %3393 = vrot.lane.b32.xlu0 %v4691_v15, %s4564_s28 }
 0xdbc   : > { %3471 = vrot.lane.b32.xlu0 %v4685_v12, %s4564_s28 }
 0xdc0   : > { %3391 = vrot.lane.b32.xlu0 %v4695_v17, %s4564_s28 }
 0xe27   : > { %v2738_v46 = vpop.xlane.xlu0 %2737 }
 0xe28   : > { %4474 = vrcp.f32 %v2738_v46 }
 0xe2b   : > { %v2820_v48 = vpop.permute.xlu0 %2819 }
 0xe2c   : > { %4255 = vmatpush3.msra.mxu1 %v2820_v48 }
 0xe2d   : > { %4353 = vmatprep.subr.bf16.mxu1 %v4352_v58 }
 0xe2f   : > { %v3233_v49 = vpop.permute.xlu0 %3232 }
 0xe30   : > { %4282 = vmatpush3.msra.mxu0 %v3233_v49 }
 0xe31   : > { %4293 = vmatprep.subr.mxu0 %v4556_v11 }
 0xe32   : > { %v4475_v50 = vpop.eup %4474 }
 0xe33   : > { %v2742_v51 = vmul.f32 %v4475_v50, %v4473_v44  ;;  %v3394_v16 = vpop.permute.xlu0 %3393 }
 0xe34   : > { %v2815_v52 = vpop.f32.mrb[30].mxu0 }
 0xe35   : > { %v4253_v53 = vpop.f32.mrb[31].mxu0  ;;  %4257 = vmatmul.mubr.msk.f32.vlgmr.msra.gmra.mrb[22].mxu1 %vm663_vm2, %v2742_v51 }
 0xe36   : > { %4263 = vmatprep.mubr.msk.f32.mxu1 %vm277_vm0, %v2815_v52  ;;  %4355 = vmatpush3.bf16.msra.mxu1 %v4352_v58 }
 0xe37   : > { %4276 = vmatprep.subr.mxu1 %v4556_v11  ;;  %v3472_v23 = vpop.permute.xlu0 %3471 }
 0xe38   : > { %v3052_v12 = vpop.f32.mrb[32].mxu0 }
 0xe39   : > { %v4270_v15 = vpop.f32.mrb[33].mxu0  ;;  %v3134_v17 = vsel %vm663_vm2, %v3052_v12, -inf }
 0xe3a   : > { %3135 = vmax.xlane.f32.xlu1 %v3134_v17 }
 0xe3b   : > { %v3392_v25 = vpop.permute.xlu0 %3391 }
 0xe3c   : > { %v3130_v47 = vpop.f32.mrb[34].mxu0 }
 0xe3d   : > { %v4275_v54 = vpop.f32.mrb[35].mxu0  ;;  %v3137_v55 = vsel %vm663_vm2, %v3130_v47, -inf }
 0xe3e   : > { %3138 = vmax.xlane.f32.xlu1 %v3137_v55 }
 0xec7   : > { %v3136_v59 = vpop.xlane.xlu1 %3135 }
 0xec8   : > { %v3140_v60 = vsub.f32 %v3052_v12, %v3136_v59  ;;  %v275_v12 = vld [vmem:[%s5086_s4 + $0x70] sm:$0xff] }
 0xeca   : > { %v3142_v61 = vmul.f32 1.442695, %v3140_v60 }
 0xecb   : > { %v3139_v62 = vpop.xlane.xlu1 %3138 }
 0xecc   : > { %4476 = vpow2.f32 %v3142_v61  ;;  %v3141_v63 = vsub.f32 %v3130_v47, %v3139_v62 }
 0xece   : > { %v3144_v0 = vmul.f32 1.442695, %v3141_v63 }
 0xed0   : > { %4478 = vpow2.f32 %v3144_v0 }
 0xed6   : > { %v4477_v1 = vpop.eup %4476 }
 0xed7   : > { %v3146_v2 = vsel %vm663_vm2, %v4477_v1, 0.0 }
 0xed8   : > { %3147 = vadd.xlane.f32.xlu1 %v3146_v2 }
 0xeda   : > { %v4479_v3 = vpop.eup %4478 }
 0xedb   : > { %v3149_v4 = vsel %vm663_vm2, %v4479_v3, 0.0 }
 0xedc   : > { %3150 = vadd.xlane.f32.xlu1 %v3149_v4 }
 0xeed   : > { %3156 = vrot.lane.b32.xlu1 %v4709_v19, %s4563_s17  ;;  %s4496_s17 = sshll.u32 %s4565_s16, 4  ;;  %s4497_s17 = int_to_ptr.vmem [resolvable:$false] %s4496_s17 }
 0xeee   : > { %s4498_s18 = scalar_lea.vmem %s4497_s17, 512  ;;  %p4499_p0 = scmp.lt.s32.totalorder %s5032_s10, %s4497_s17 }
 0xeef   : > { %p4500_p1 = scmp.lt.s32.totalorder %s4498_s18, %s4492_s25 }
 0xef1   : > { %3469 = vrot.lane.b32.xlu1 %v4689_v14, %s4564_s28  ;;  %v4356_v14 = vpack.c.bf16 %v274_v9, %v273_v8  ;;  %p4501_p2 = por %p4500_p1, %p4499_p0 }
 0xef3   : > { %p4502_p3 = pnand %p4501_p2, %p4495_p13 }
 0xf08   : > { %v2891_v5 = vpop.f32.mrb[22].mxu1 }
 0xf09   : > { %v4258_v6 = vpop.f32.mrb[23].mxu1  ;;  %4264 = vmatmul.mubr.msk.f32.vlgmr.msra.gmra.mrb[10].mxu1 %vm277_vm0, %v2891_v5 }
 0xf0a   : > { %4278 = vmatprep.mubr.msk.f32.mxu1 %vm4557_vm1, %v4556_v11 }
 0xf65   : > { %v3148_v7 = vpop.xlane.xlu1 %3147 }
 0xf66   : > { %4480 = vrcp.f32 %v3148_v7 }
 0xf69   : > { %v3151_v10 = vpop.xlane.xlu1 %3150 }
 0xf6a   : > { %4482 = vrcp.f32 %v3151_v10 }
 0xf6d   : > { %v3157_v13 = vpop.permute.xlu1 %3156 }
 0xf6e   : > { %4277 = vmatpush3.msra.mxu1 %v3157_v13 }
 0xf6f   : > { %4357 = vmatprep.subr.bf16.mxu1 %v4356_v14 }
 0xf70   : > { %v4481_v20 = vpop.eup %4480 }
 0xf71   : > { %v3154_v21 = vmul.f32 %v4481_v20, %v4477_v1  ;;  %v3470_v30 = vpop.permute.xlu1 %3469 }
 0xf73   : > { %4279 = vmatmul.mubr.msk.f32.vlgmr.msra.gmra.mrb[24].mxu1 %vm663_vm2, %v3154_v21 }
 0xf74   : > { %v4483_v22 = vpop.eup %4482  ;;  %4359 = vmatpush3.bf16.msra.mxu1 %v4356_v14 }
 0xf75   : > { %v3155_v24 = vmul.f32 %v4483_v22, %v4479_v3  ;;  %4298 = vmatprep.subr.mxu1 %v4556_v11 }
 0xf77   : > { %4284 = vmatmul.mubr.msk.f32.vlgmr.msra.gmra.mrb[36].mxu0 %vm663_vm2, %v3155_v24 }
 0xf78   : > { %4294 = vmatpush3.xpose.msk.msra.mxu0 %vm277_vm0, %v3394_v16  ;;  %4295 = vmatprep.mubr.msk.f32.mxu0 %vm4557_vm1, %v4556_v11 }
 0xf79   : > { %4303 = vmatprep.subr.mxu0 %v4556_v11 }
 0xf7b   : > { %4296 = vmatmul.mubr.msk.f32.vlgmr.msra.gmra.mrb[38].mxu0 %vm277_vm0, %v3392_v25 }
 0xf7c   : > { %4305 = vmatprep.mubr.msk.f32.mxu0 %vm4557_vm1, %v4556_v11 }
0x1046   : > { %v3228_v26 = vpop.f32.mrb[24].mxu1 }
0x1047   : > { %v4280_v27 = vpop.f32.mrb[25].mxu1  ;;  %4290 = vmatprep.mubr.msk.f32.mxu1 %vm277_vm0, %v3228_v26 }
0x104a   : > { %v3304_v28 = vpop.f32.mrb[36].mxu0 }
0x104b   : > { %v4285_v29 = vpop.f32.mrb[37].mxu0  ;;  %4291 = vmatmul.mubr.msk.f32.vlgmr.msra.gmra.mrb[10].mxu1 %vm277_vm0, %v3304_v28 }
0x104c   : > { %4299 = vmatpush3.xpose.msk.msra.mxu1 %vm277_vm0, %v3472_v23  ;;  %4300 = vmatprep.mubr.msk.f32.mxu1 %vm4557_vm1, %v4556_v11 }
0x104d   : > { %4308 = vmatprep.subr.mxu1 %v4556_v11 }
0x104e   : > { %v3465_v31 = vpop.f32.mrb[38].mxu0 }
0x104f   : > { %v4297_v32 = vpop.f32.mrb[39].mxu0  ;;  %4301 = vmatmul.mubr.msk.f32.vlgmr.msra.gmra.mrb[26].mxu1 %vm277_vm0, %v3470_v30  ;;  %v3547_v33 = vsel %vm663_vm2, %v3465_v31, -inf }
0x1050   : > { %3548 = vmax.xlane.f32.xlu0 %v3547_v33  ;;  %4310 = vmatprep.mubr.msk.f32.mxu1 %vm4557_vm1, %v4556_v11 }
0x10dd   : > { %v3549_v34 = vpop.xlane.xlu0 %3548 }
0x10de   : > { %v3553_v35 = vsub.f32 %v3465_v31, %v3549_v34 }
0x10e0   : > { %v3555_v36 = vmul.f32 1.442695, %v3553_v35 }
0x10e2   : > { %4484 = vpow2.f32 %v3555_v36 }
0x10ec   : > { %v4485_v37 = vpop.eup %4484 }
0x10ed   : > { %v3559_v38 = vsel %vm663_vm2, %v4485_v37, 0.0 }
0x10ee   : > { %3560 = vadd.xlane.f32.xlu0 %v3559_v38 }
0x1122   : > { %v3543_v39 = vpop.f32.mrb[26].mxu1 }
0x1123   : > { %v4302_v40 = vpop.f32.mrb[27].mxu1  ;;  %v3550_v41 = vsel %vm663_vm2, %v3543_v39, -inf }
0x1124   : > { %3551 = vmax.xlane.f32.xlu1 %v3550_v41 }
0x1135   : > { %3645 = vrot.lane.b32.xlu1 %v4703_v18, %s4564_s28 }
0x117b   : > { %v3561_v48 = vpop.xlane.xlu0 %3560 }
0x11b1   : > { %v3552_v42 = vpop.xlane.xlu1 %3551 }
0x11b2   : > { %v3554_v43 = vsub.f32 %v3543_v39, %v3552_v42 }
0x11b4   : > { %v3557_v44 = vmul.f32 1.442695, %v3554_v43 }
0x11b5   : > { %v3646_v11 = vpop.permute.xlu1 %3645 }
0x11b6   : > { %4486 = vpow2.f32 %v3557_v44  ;;  %4309 = vmatpush3.msra.mxu1 %v3646_v11 }
0x11b7   : > { %4488 = vrcp.f32 %v3561_v48 }
0x11c0   : > { %v4487_v45 = vpop.eup %4486 }
0x11c1   : > { %v3562_v46 = vsel %vm663_vm2, %v4487_v45, 0.0  ;;  %v4489_v50 = vpop.eup %4488 }
0x11c2   : > { %3563 = vadd.xlane.f32.xlu0 %v3562_v46  ;;  %v3567_v51 = vmul.f32 %v4489_v50, %v4485_v37 }
0x11d8   : > { %3569 = vrot.lane.b32.xlu0 %v4709_v19, %s4564_s28  ;;  %v276_v19 = vld [vmem:[%s5086_s4 + $0x78] sm:$0xff] }
0x11d9   : > { %v4360_v15 = vpack.c.bf16 %v276_v19, %v275_v12 }
0x11db   : > { %4361 = vmatprep.subr.bf16.mxu1 %v4360_v15 }
0x124f   : > { %v3564_v49 = vpop.xlane.xlu0 %3563 }
0x1250   : > { %4490 = vrcp.f32 %v3564_v49 }
0x1253   : > { %v3570_v18 = vpop.permute.xlu0 %3569 }
0x1254   : > { %4304 = vmatpush3.msra.mxu0 %v3570_v18 }
0x1255   : > { %4306 = vmatmul.mubr.msk.f32.vlgmr.msra.gmra.mrb[40].mxu0 %vm663_vm2, %v3567_v51 }
0x125a   : > { %v4491_v52 = vpop.eup %4490 }
0x125b   : > { %v3568_v53 = vmul.f32 %v4491_v52, %v4487_v45 }
0x125d   : > { %4311 = vmatmul.mubr.msk.f32.vlgmr.msra.gmra.mrb[28].mxu1 %vm663_vm2, %v3568_v53 }
0x125e   : > { %4363 = vmatpush3.bf16.msra.mxu1 %v4360_v15 }
0x1328   : > { %v3641_v17 = vpop.f32.mrb[40].mxu0 }
0x1329   : > { %v4307_v47 = vpop.f32.mrb[41].mxu0  ;;  %4317 = vmatprep.mubr.msk.f32.mxu1 %vm277_vm0, %v3641_v17 }
0x1330   : > { %v3717_v54 = vpop.f32.mrb[28].mxu1 }
0x1331   : > { %v4312_v55 = vpop.f32.mrb[29].mxu1  ;;  %4318 = vmatmul.mubr.msk.f32.vlgmr.msra.gmra.mrb[10].mxu1 %vm277_vm0, %v3717_v54 }
0x1404   : > { %v4319_v57 = vpop.f32.mrb[10].mxu1 }
0x1405   : > { %v3812_v58 = vadd.f32 %v4319_v57, %v3968_v56  ;;  %v3793_v59 = vpop.f32.mrb[11].mxu1 }
0x1406   : > { %v3811_v60 = vadd.f32 %v3968_v56, %v3793_v59 }
0x1407   : > { %3814 = vst.msk [vmem:[%s245_s9 + $0x8] sm:$0xff] %vm277_vm0, %v3812_v58 }
0x1408   : > { %3813 = vst.msk [vmem:[%s245_s9] sm:$0xff] %vm277_vm0, %v3811_v60 }
0x1409   : > { %4505 = shalt.err (!%p4502_p3)
}
0x140a   : > { %s4506_s19 = scalar_lea.hbm %s5037_s14, 256  ;;  %s4510_s28 = scalar_lea.hbm %s5088_s6, 512 }
0x140b   : > { %p4507_p4 = scmp.ne.s32.totalorder %s5037_s14, %s4506_s19  ;;  %p4511_p9 = scmp.lt.u32.totalorder %s5037_s14, %s5088_s6 }
0x140c   : > { %p4512_p10 = scmp.lt.u32.totalorder %s4510_s28, %s4506_s19  ;;  %p4514_p12 = scmp.lt.u32.totalorder %s4506_s19, %s5037_s14 }
0x140d   : > { %p4508_p7 = pnand %p4507_p4, %p4641_p5 }
0x140e   : > { %p4513_p11 = por %p4512_p10, %p4511_p9 }
0x140f   : > { %p4509_p8 = pneg %p4508_p7 }
0x1410   : > { %p4515_p13 = por %p4514_p12, %p4513_p11 }
0x1412   : > { %p4516_p0 = pnand %p4515_p13, %p4509_p8 }
0x1414   : > { %4519 = shalt.err (!%p4516_p0)
}
0x1415   : > { %s4566_s11 = smov 128   ;;  %s4567_s12 = smov 8  }
0x1416   : > { %4378 = dma.vmem_to_hbm [thread:$0]  (%p4641_p5), %s5032_s10, 256, %s5037_s14, %s5041_s15, %s4566_s11, %s4566_s11, %s4567_s12  }
0x1417 PF: > { %p4384_p1 = scmp.ge.s32.totalorder %s4554_s24, 2  ;;  %s3844_s13 = sand.u32 1, %s4542_s21  }
0x1418   : > { %s3845_s25 = scalar_lea.sflag [#allocation3], %s3844_s13 }
0x1419   : > { %p4381_p2 = pnand %p4384_p1, %p4645_p6 }
0x141b   : > { %4537 = dma.done.wait (!%p4381_p2), %s3845_s25, 256  }
0x141c   : > { %4539 = vsyncadd (!%p4381_p2), %s3845_s25, 4294967040  ;;  %p16_p3 = scmp.ge.s32.totalorder %s4628_s27, 4   ;;  %s5091_s21 = smov %s4546_s22 }
0x141d   : > { %s5092_s22 = smov %s4550_s23  ;;  %s5093_s23 = smov %s4639_s30 }
0x141e   : > { %s5094_s24 = smov %s4628_s27  ;;  %18 = sbr.rel (!%p16_p3) target bundleno = 3 (0x3), region = 79 }
0x1425   :  { %3850 = vsyncpa [#allocation3], 1 }
0x1426   :  { %3852 = vsyncpa [#allocation3 + $0x1], 1 }

</bundles_post_ra>
